<compile_context>
chip_gen: v6e
topology: v6e:2x2x1
jax: 0.10.0
libtpu: 0.0.40
codegen_flags: <defaults>
</compile_context>

<pallas_src>
import jax
import jax.numpy as jnp
from jax.experimental import pallas as pl
from jax.experimental.pallas import tpu as pltpu


def _bilinear_kernel(l_ref, c_ref, w_ref, bias_ref, o_ref):
    """Computes one (tile_n, tile_k) output tile.

    l_ref:    (tile_n, L_dim)           looped operand (smaller feature dim)
    c_ref:    (tile_n, C_dim)           contracted operand (larger feature dim)
    w_ref:    (L_dim * C_dim, tile_k)   flattened contraction-major weights
    bias_ref: (1, tile_k)
    o_ref:    (tile_n, tile_k)
    """
    l = l_ref[...]
    c = c_ref[...]
    l_dim = l_ref.shape[1]

    # Flattened per-row outer product (tile_n, L_dim*C_dim), built as a lane
    # concat of L_dim scaled copies of `c`.  Cheapest when C_dim is a
    # multiple of 128 (vreg-aligned pieces).
    # TODO(synk): for very large L_dim, add an "arbitrary" contraction grid
    # axis with a pl.when-guarded accumulator instead of this static unroll.
    if l_dim == 1:
        x = l * c
    else:
        x = jnp.concatenate([l[:, i:i + 1] * c for i in range(l_dim)], axis=-1)

    acc = jnp.dot(x, w_ref[...], preferred_element_type=jnp.float32)
    o_ref[...] = (acc + bias_ref[...].astype(jnp.float32)).astype(o_ref.dtype)


def _pick_tile(dim, candidates):
    for cand in candidates:
        if dim % cand == 0:
            return cand
    return dim


def _vmem_capacity_bytes():
    try:
        info = pltpu.get_tpu_info()
        cap = getattr(info, "vmem_capacity_bytes", None)
        if cap:
            return int(cap)
    except Exception:
        pass
    return 64 << 20  # conservative fallback (v7x per-core VMEM)


def prepare_bilinear_weight(W, *, loop_over_a=None):
    """One-time weight prep (hoist out of the per-call path).

    Returns (w_flat, loop_over_a) with w_flat laid out contraction-major:
      loop_over_a=True :  w_flat[i*B_dim + j, k] = W[k, i, j]   (loop over A)
      loop_over_a=False:  w_flat[j*A_dim + i, k] = W[k, i, j]   (loop over B)
    """
    fusion_dim, A_dim, B_dim = W.shape
    if loop_over_a is None:
        loop_over_a = A_dim <= B_dim  # loop over the smaller feature dim
    if loop_over_a:
        w_flat = jnp.transpose(W, (1, 2, 0)).reshape(A_dim * B_dim, fusion_dim)
    else:
        w_flat = jnp.transpose(W, (2, 1, 0)).reshape(B_dim * A_dim, fusion_dim)
    return w_flat, loop_over_a


def bilinear_fusion_prepared(A, B, w_flat, bias, *, loop_over_a,
                             tile_n=None, tile_k=None, cast_to_bf16=False):
    """out[n, k] = bias[k] + sum_{i,j} A[n, i] * W[k, i, j] * B[n, j]."""
    N, A_dim = A.shape
    N_b, B_dim = B.shape
    fusion_dim = bias.shape[0]
    assert N == N_b, "A and B must share the batch dimension"
    assert w_flat.shape == (A_dim * B_dim, fusion_dim), "w_flat shape mismatch"

    if loop_over_a:
        loop_op, contract_op = A, B
    else:
        loop_op, contract_op = B, A
    L_dim = loop_op.shape[1]
    C_dim = contract_op.shape[1]
    LC = L_dim * C_dim

    out_dtype = jnp.result_type(A.dtype, B.dtype)
    if cast_to_bf16:
        loop_op = loop_op.astype(jnp.bfloat16)
        contract_op = contract_op.astype(jnp.bfloat16)
        w_flat = w_flat.astype(jnp.bfloat16)

    # Lane-dense output tiles; tile_n is the MXU M dimension, so default big.
    if tile_n is None:
        tile_n = _pick_tile(N, (256, 128, 64, 32, 16, 8))
    if tile_k is None:
        tile_k = _pick_tile(fusion_dim, (512, 256, 128))
    assert N % tile_n == 0 and (tile_n % 8 == 0 or tile_n == N), (
        f"tile_n={tile_n} must divide N={N} and be a multiple of 8 (or == N)")

    # VMEM budget from actual chip capacity (no hard 64 MiB clamp).
    vmem_cap = _vmem_capacity_bytes()
    vmem_budget = int(vmem_cap * 0.85)

    isz = lambda x: jnp.dtype(x.dtype).itemsize
    out_isz = jnp.dtype(out_dtype).itemsize

    def total_vmem(tk, w_bufs):
        return (2 * (tile_n * L_dim * isz(loop_op)
                     + tile_n * C_dim * isz(contract_op)
                     + tk * isz(bias)
                     + tile_n * tk * out_isz)
                + w_bufs * LC * tk * isz(w_flat))

    # W's block index changes only once per full inner-n sweep, so single-
    # buffering it (when it dominates VMEM) exposes one DMA per k tile,
    # amortized over N//tile_n steps.
    w_bufs = 2
    if total_vmem(tile_k, w_bufs) > vmem_budget and (N // tile_n) > 1:
        w_bufs = 1
    while (total_vmem(tile_k, w_bufs) > vmem_budget and tile_k > 128
           and tile_k % 2 == 0 and (tile_k // 2) % 128 == 0
           and fusion_dim % (tile_k // 2) == 0):
        tile_k //= 2

    assert fusion_dim % tile_k == 0 and (tile_k % 128 == 0
                                         or tile_k == fusion_dim), (
        f"tile_k={tile_k} must divide fusion_dim={fusion_dim} and be a "
        f"multiple of 128 (or == fusion_dim)")

    est_vmem = total_vmem(tile_k, w_bufs)
    vmem_limit = int(min(max(est_vmem + (8 << 20), 32 << 20), vmem_budget))
    vmem_limit = max(vmem_limit, min(est_vmem + (4 << 20), vmem_cap))

    bias2d = bias.reshape(1, fusion_dim)

    # Grid: fusion-dim tiles outer ("parallel" -> cross-core sharded axis),
    # N tiles inner ("arbitrary" -> W stays resident across the inner sweep).
    grid = (fusion_dim // tile_k, N // tile_n)

    if w_bufs == 1:
        w_spec = pl.BlockSpec((LC, tile_k), lambda k, n: (0, k),
                              pipeline_mode=pl.Buffered(1))
    else:
        w_spec = pl.BlockSpec((LC, tile_k), lambda k, n: (0, k))

    # Honest byte count: A/B blocks are re-streamed once per k tile.
    k_tiles = fusion_dim // tile_k
    n_tiles = N // tile_n
    bytes_accessed = int(
        k_tiles * (loop_op.size * isz(loop_op)
                   + contract_op.size * isz(contract_op))
        + w_flat.size * isz(w_flat)
        + n_tiles * bias.size * isz(bias)
        + N * fusion_dim * out_isz)
    cost = pl.CostEstimate(
        flops=int(2 * N * fusion_dim * LC + N * LC + N * fusion_dim),
        transcendentals=0,
        bytes_accessed=bytes_accessed,
    )

    return pl.pallas_call(
        _bilinear_kernel,
        out_shape=jax.ShapeDtypeStruct((N, fusion_dim), out_dtype),
        grid_spec=pltpu.PrefetchScalarGridSpec(
            num_scalar_prefetch=0,
            grid=grid,
            in_specs=[
                pl.BlockSpec((tile_n, L_dim), lambda k, n: (n, 0)),
                pl.BlockSpec((tile_n, C_dim), lambda k, n: (n, 0)),
                w_spec,
                pl.BlockSpec((1, tile_k), lambda k, n: (0, k)),
            ],
            out_specs=pl.BlockSpec((tile_n, tile_k), lambda k, n: (n, k)),
        ),
        compiler_params=pltpu.CompilerParams(
            dimension_semantics=("parallel", "arbitrary"),
            vmem_limit_bytes=vmem_limit,
        ),
        cost_estimate=cost,
    )(loop_op, contract_op, w_flat, bias2d)


def bilinear_fusion(A, B, W, bias, **kwargs):
    """Convenience wrapper: preps W per call. Prefer hoisting
    prepare_bilinear_weight to weight-prep time and calling
    bilinear_fusion_prepared directly (avoids re-reading/re-writing W in HBM
    on every call)."""
    w_flat, loop_over_a = prepare_bilinear_weight(W)
    return bilinear_fusion_prepared(A, B, w_flat, bias,
                                    loop_over_a=loop_over_a, **kwargs)


if __name__ == "__main__":
    # Small shapes consistent with the module's forward (2-D inputs).
    # C_dim (the larger feature dim) is a multiple of 128 for vreg-aligned
    # lane concat in the kernel.
    N, A_dim, B_dim, fusion_dim = 64, 16, 128, 256

    key = jax.random.PRNGKey(0)
    kA, kB, kW, kb = jax.random.split(key, 4)

    # nn.Bilinear-style init: uniform(-bound, bound), bound = 1/sqrt(in1).
    bound = 1.0 / (A_dim ** 0.5)

    # Snap values to bf16-representable floats so the kernel's MXU path and
    # the f32 XLA reference agree tightly regardless of matmul pass count.
    snap = lambda x: x.astype(jnp.bfloat16).astype(jnp.float32)

    W = snap(jax.random.uniform(kW, (fusion_dim, A_dim, B_dim),
                                minval=-bound, maxval=bound, dtype=jnp.float32))
    bias = snap(jax.random.uniform(kb, (fusion_dim,),
                                   minval=-bound, maxval=bound,
                                   dtype=jnp.float32))
    A = snap(jax.random.normal(kA, (N, A_dim), dtype=jnp.float32))
    B = snap(jax.random.normal(kB, (N, B_dim), dtype=jnp.float32))

    # Weight prep hoisted out of the fused call (one-time transform).
    w_flat, loop_over_a = prepare_bilinear_weight(W)

    # Explicit small tiles so the demo exercises a real 2x2 grid.
    out = bilinear_fusion_prepared(A, B, w_flat, bias, loop_over_a=loop_over_a,
                                   tile_n=32, tile_k=128)
    out = jax.block_until_ready(out)

    # Pure-JAX reference (full-f32 precision).
    ref = jnp.einsum("ni,kij,nj->nk", A, W, B,
                     precision=jax.lax.Precision.HIGHEST) + bias

    assert out.shape == (N, fusion_dim)
    max_err = float(jnp.max(jnp.abs(out - ref)))
    assert jnp.allclose(out, ref, atol=2e-3, rtol=2e-3), max_err
    print("KERNEL_OK")
</pallas_src>

<mosaic_0001>
module attributes {stable_mosaic.version = 11 : i64} {
  func.func @_bilinear_kernel(%arg0: i32, %arg1: i32, %arg2: memref<32x16xf32, #tpu.memory_space<vmem>>, %arg3: memref<32x128xf32, #tpu.memory_space<vmem>>, %arg4: memref<2048x128xf32, #tpu.memory_space<vmem>>, %arg5: memref<1x128xf32, #tpu.memory_space<vmem>>, %arg6: memref<32x128xf32, #tpu.memory_space<vmem>>) attributes {dimension_semantics = [#tpu.dimension_semantics<parallel>, #tpu.dimension_semantics<arbitrary>], iteration_bounds = array<i64: 2, 2>, scalar_prefetch = 0 : i64, scratch_operands = 0 : i64, tpu.core_type = #tpu.core_type<tc>, window_params = [{transform_indices = @transform_0, window_bounds = array<i64: 32, 16>}, {transform_indices = @transform_1, window_bounds = array<i64: 32, 128>}, {transform_indices = @transform_2, window_bounds = array<i64: 2048, 128>}, {transform_indices = @transform_3, window_bounds = array<i64: 1, 128>}, {transform_indices = @transform_4, window_bounds = array<i64: 32, 128>}]} {
    %c0 = arith.constant 0 : index
    %c0_0 = arith.constant 0 : index
    %0 = vector.load %arg2[%c0, %c0_0] : memref<32x16xf32, #tpu.memory_space<vmem>>, vector<32x16xf32>
    %c0_1 = arith.constant 0 : index
    %c0_2 = arith.constant 0 : index
    %1 = vector.load %arg3[%c0_1, %c0_2] : memref<32x128xf32, #tpu.memory_space<vmem>>, vector<32x128xf32>
    %2 = vector.extract_strided_slice %0 {offsets = [0, 0], sizes = [32, 1], strides = [1, 1]} : vector<32x16xf32> to vector<32x1xf32>
    %3 = vector.broadcast %2 : vector<32x1xf32> to vector<32x128xf32>
    %4 = arith.mulf %3, %1 : vector<32x128xf32>
    %5 = vector.extract_strided_slice %0 {offsets = [0, 1], sizes = [32, 1], strides = [1, 1]} : vector<32x16xf32> to vector<32x1xf32>
    %6 = vector.broadcast %5 : vector<32x1xf32> to vector<32x128xf32>
    %7 = arith.mulf %6, %1 : vector<32x128xf32>
    %8 = vector.extract_strided_slice %0 {offsets = [0, 2], sizes = [32, 1], strides = [1, 1]} : vector<32x16xf32> to vector<32x1xf32>
    %9 = vector.broadcast %8 : vector<32x1xf32> to vector<32x128xf32>
    %10 = arith.mulf %9, %1 : vector<32x128xf32>
    %11 = vector.extract_strided_slice %0 {offsets = [0, 3], sizes = [32, 1], strides = [1, 1]} : vector<32x16xf32> to vector<32x1xf32>
    %12 = vector.broadcast %11 : vector<32x1xf32> to vector<32x128xf32>
    %13 = arith.mulf %12, %1 : vector<32x128xf32>
    %14 = vector.extract_strided_slice %0 {offsets = [0, 4], sizes = [32, 1], strides = [1, 1]} : vector<32x16xf32> to vector<32x1xf32>
    %15 = vector.broadcast %14 : vector<32x1xf32> to vector<32x128xf32>
    %16 = arith.mulf %15, %1 : vector<32x128xf32>
    %17 = vector.extract_strided_slice %0 {offsets = [0, 5], sizes = [32, 1], strides = [1, 1]} : vector<32x16xf32> to vector<32x1xf32>
    %18 = vector.broadcast %17 : vector<32x1xf32> to vector<32x128xf32>
    %19 = arith.mulf %18, %1 : vector<32x128xf32>
    %20 = vector.extract_strided_slice %0 {offsets = [0, 6], sizes = [32, 1], strides = [1, 1]} : vector<32x16xf32> to vector<32x1xf32>
    %21 = vector.broadcast %20 : vector<32x1xf32> to vector<32x128xf32>
    %22 = arith.mulf %21, %1 : vector<32x128xf32>
    %23 = vector.extract_strided_slice %0 {offsets = [0, 7], sizes = [32, 1], strides = [1, 1]} : vector<32x16xf32> to vector<32x1xf32>
    %24 = vector.broadcast %23 : vector<32x1xf32> to vector<32x128xf32>
    %25 = arith.mulf %24, %1 : vector<32x128xf32>
    %26 = vector.extract_strided_slice %0 {offsets = [0, 8], sizes = [32, 1], strides = [1, 1]} : vector<32x16xf32> to vector<32x1xf32>
    %27 = vector.broadcast %26 : vector<32x1xf32> to vector<32x128xf32>
    %28 = arith.mulf %27, %1 : vector<32x128xf32>
    %29 = vector.extract_strided_slice %0 {offsets = [0, 9], sizes = [32, 1], strides = [1, 1]} : vector<32x16xf32> to vector<32x1xf32>
    %30 = vector.broadcast %29 : vector<32x1xf32> to vector<32x128xf32>
    %31 = arith.mulf %30, %1 : vector<32x128xf32>
    %32 = vector.extract_strided_slice %0 {offsets = [0, 10], sizes = [32, 1], strides = [1, 1]} : vector<32x16xf32> to vector<32x1xf32>
    %33 = vector.broadcast %32 : vector<32x1xf32> to vector<32x128xf32>
    %34 = arith.mulf %33, %1 : vector<32x128xf32>
    %35 = vector.extract_strided_slice %0 {offsets = [0, 11], sizes = [32, 1], strides = [1, 1]} : vector<32x16xf32> to vector<32x1xf32>
    %36 = vector.broadcast %35 : vector<32x1xf32> to vector<32x128xf32>
    %37 = arith.mulf %36, %1 : vector<32x128xf32>
    %38 = vector.extract_strided_slice %0 {offsets = [0, 12], sizes = [32, 1], strides = [1, 1]} : vector<32x16xf32> to vector<32x1xf32>
    %39 = vector.broadcast %38 : vector<32x1xf32> to vector<32x128xf32>
    %40 = arith.mulf %39, %1 : vector<32x128xf32>
    %41 = vector.extract_strided_slice %0 {offsets = [0, 13], sizes = [32, 1], strides = [1, 1]} : vector<32x16xf32> to vector<32x1xf32>
    %42 = vector.broadcast %41 : vector<32x1xf32> to vector<32x128xf32>
    %43 = arith.mulf %42, %1 : vector<32x128xf32>
    %44 = vector.extract_strided_slice %0 {offsets = [0, 14], sizes = [32, 1], strides = [1, 1]} : vector<32x16xf32> to vector<32x1xf32>
    %45 = vector.broadcast %44 : vector<32x1xf32> to vector<32x128xf32>
    %46 = arith.mulf %45, %1 : vector<32x128xf32>
    %47 = vector.extract_strided_slice %0 {offsets = [0, 15], sizes = [32, 1], strides = [1, 1]} : vector<32x16xf32> to vector<32x1xf32>
    %48 = vector.broadcast %47 : vector<32x1xf32> to vector<32x128xf32>
    %49 = arith.mulf %48, %1 : vector<32x128xf32>
    %50 = tpu.concatenate %4, %7, %10, %13, %16, %19, %22, %25, %28, %31, %34, %37, %40, %43, %46, %49 in 1 : vector<32x128xf32>, vector<32x128xf32>, vector<32x128xf32>, vector<32x128xf32>, vector<32x128xf32>, vector<32x128xf32>, vector<32x128xf32>, vector<32x128xf32>, vector<32x128xf32>, vector<32x128xf32>, vector<32x128xf32>, vector<32x128xf32>, vector<32x128xf32>, vector<32x128xf32>, vector<32x128xf32>, vector<32x128xf32> -> vector<32x2048xf32>
    %c0_3 = arith.constant 0 : index
    %c0_4 = arith.constant 0 : index
    %51 = vector.load %arg4[%c0_3, %c0_4] : memref<2048x128xf32, #tpu.memory_space<vmem>>, vector<2048x128xf32>
    %cst = arith.constant dense<0.000000e+00> : vector<32x128xf32>
    %52 = tpu.matmul %50, %51, %cst {dimension_numbers = #tpu.dot_dimension_numbers<[1], [0], [0], [1], [0, 0, 1, 1], [], []>} : vector<32x2048xf32>, vector<2048x128xf32>, vector<32x128xf32> -> vector<32x128xf32>
    %c0_5 = arith.constant 0 : index
    %c0_6 = arith.constant 0 : index
    %53 = vector.load %arg5[%c0_5, %c0_6] : memref<1x128xf32, #tpu.memory_space<vmem>>, vector<1x128xf32>
    %54 = vector.broadcast %53 : vector<1x128xf32> to vector<32x128xf32>
    %55 = arith.addf %52, %54 : vector<32x128xf32>
    %c0_7 = arith.constant 0 : index
    %c0_8 = arith.constant 0 : index
    %56 = vector.load %arg6[%c0_7, %c0_8] : memref<32x128xf32, #tpu.memory_space<vmem>>, vector<32x128xf32>
    tpu.vector_store %arg6[%c0_7, %c0_8], %55 {strides = array<i32>} : memref<32x128xf32, #tpu.memory_space<vmem>>, vector<32x128xf32>,
    return
  }
  func.func @transform_0(%arg0: i32, %arg1: i32) -> (i32, i32) {
    %c0_i32 = arith.constant 0 : i32
    %c0_i32_0 = arith.constant 0 : i32
    return %arg1, %c0_i32 : i32, i32
  }
  func.func @transform_1(%arg0: i32, %arg1: i32) -> (i32, i32) {
    %c0_i32 = arith.constant 0 : i32
    %c0_i32_0 = arith.constant 0 : i32
    return %arg1, %c0_i32 : i32, i32
  }
  func.func @transform_2(%arg0: i32, %arg1: i32) -> (i32, i32) {
    %c0_i32 = arith.constant 0 : i32
    %c0_i32_0 = arith.constant 0 : i32
    return %c0_i32, %arg0 : i32, i32
  }
  func.func @transform_3(%arg0: i32, %arg1: i32) -> (i32, i32) {
    %c0_i32 = arith.constant 0 : i32
    %c0_i32_0 = arith.constant 0 : i32
    return %c0_i32, %arg0 : i32, i32
  }
  func.func @transform_4(%arg0: i32, %arg1: i32) -> (i32, i32) {
    %c0_i32 = arith.constant 0 : i32
    return %arg1, %arg0 : i32, i32
  }
}

</mosaic_0001>

<bundles_post_ra>
// kernel: tpu_custom_call.1
= control target key start
LH: loop header
LB: loop body
LE: loop exit
PB: predicated region body
PF: predicated region fallthrough
CT: control target
= control target key end

     0   :  { %s3503_s0 = inlined_call_operand.vmem [shape: f32[64,16], index: 0, kind: input, shape index: {}]   ;;  %s3504_s1 = inlined_call_operand.hbm [shape: f32[64,128], index: 1, kind: input, shape index: {}]   ;;  %s3505_s2 = inlined_call_operand.hbm [shape: f32[2048,256], index: 2, kind: input, shape index: {}]   ;;  %s3506_s3 = inlined_call_operand.hbm [shape: f32[1,256], index: 3, kind: input, shape index: {}]   ;;  %s3507_s4 = inlined_call_operand.hbm [shape: f32[64,256], index: 4, kind: output, shape index: {}]  }
   0x1   :  { %3521 = sst [smem:[#allocation23_spill]] %s3503_s0 }
   0x2   :  { %3522 = sst [smem:[#allocation24_spill]] %s3504_s1 }
   0x3   :  { %3523 = sst [smem:[#allocation25_spill]] %s3505_s2 }
   0x4   :  { %3524 = sst [smem:[#allocation26_spill]] %s3507_s4 }
   0x5   :  { %9 = vsyncpa [#allocation3], 0 }
   0x6   :  { %11 = vsyncpa [#allocation3 + $0x1], 0 }
   0x7   :  { %12 = vsyncpa [#allocation6], 0 }
   0x8   :  { %14 = vsyncpa [#allocation6 + $0x1], 0 }
   0x9   :  { %15 = vsyncpa [#allocation4], 0 }
   0xa   :  { %17 = vsyncpa [#allocation4 + $0x1], 0  ;;  %s2640_s15 = smov 0   ;;  %s2642_s16 = smov 0  }
   0xb   :  { %s2644_s17 = smov 0   ;;  %s2646_s18 = smov 0  }
   0xc   :  { %s2648_s19 = smov 0   ;;  %s2650_s20 = smov 0  }
   0xd   :  { %s2652_s21 = smov 0   ;;  %s2654_s22 = smov 0  }
   0xe   :  { %s2656_s23 = smov 0   ;;  %s2658_s24 = smov 0  }
   0xf   :  { %s2660_s25 = smov 0   ;;  %s2662_s26 = smov 0  }
  0x10   :  { %s2664_s27 = smov 0   ;;  %s2666_s28 = smov 0  }
  0x11 LB: > { %3525 = sst [smem:[#allocation12_spill]] %s2535_s15  ;;  %p76_p0 = scmp.eq.s32.totalorder %s2587_s28, 0  ;;  %s2587_s28 = sphi %s2666_s28, %s23_s28   ;;  %s2583_s27 = sphi %s2664_s27, %s3577_s27   ;;  %s2579_s26 = sphi %s2662_s26, %s3566_s26   ;;  %s2575_s25 = sphi %s2660_s25, %s3565_s25   ;;  %s2571_s24 = sphi %s2658_s24, %s3564_s24   ;;  %s2567_s23 = sphi %s2656_s23, %s3576_s23   ;;  %s2563_s22 = sphi %s2654_s22, %s3575_s22   ;;  %s2559_s21 = sphi %s2652_s21, %s3574_s21   ;;  %s2555_s20 = sphi %s2650_s20, %s3573_s20   ;;  %s2551_s19 = sphi %s2648_s19, %s3572_s19   ;;  %s2547_s18 = sphi %s2646_s18, %s3571_s18   ;;  %s2543_s17 = sphi %s2644_s17, %s3570_s17   ;;  %s2539_s16 = sphi %s2642_s16, %s3569_s16   ;;  %s2535_s15 = sphi %s2640_s15, %s3568_s15  }
  0x12   : > { %3526 = sst [smem:[#allocation13_spill]] %s2567_s23  ;;  %p101_p1 = scmp.ne.s32.totalorder %s2555_s20, %s2551_s19 }
  0x13   : > { %3527 = sst [smem:[#allocation14_spill]] %s2571_s24  ;;  %p107_p2 = scmp.ne.s32.totalorder %s2551_s19, %s2547_s18 }
  0x14   : > { %3528 = sst [smem:[#allocation15_spill]] %s2575_s25  ;;  %p3514_p3 = scmp.lt.s32.totalorder %s2587_s28, 4 }
  0x15   : > { %3529 = sst [smem:[#allocation16_spill]] %s2579_s26  ;;  %p103_p4 = por %p101_p1, %p76_p0 }
  0x16   : > { %3530 = sst [smem:[#allocation17_spill]] %s2583_s27  ;;  %s215_s30 = sand.u32 1, %s2587_s28  }
  0x17   : > { %s3508_s5 = sand.u32 1, %s2555_s20   ;;  %s1765_s7 = sshll.u32 %s2583_s27, 7 }
  0x18   : > { %s1764_s6 = sshll.u32 %s3508_s5, 11  ;;  %s3531_s2 = sld [smem:[#allocation25_spill]] }
  0x19   : > { %s219_s11 = scalar_lea.vmem [#allocation5], %s1764_s6  ;;  %p2729_p5 = pnand %p3514_p3, %p103_p4 }
  0x1a   : > { %s225_s12 = sshll.u32 %s219_s11, 4  ;;  %p1767_p6 = scmp.ge.s32.totalorder %s2587_s28, 1  ;;  %s226_s12 = int_to_ptr.vmem [resolvable:$true] %s225_s12 }
  0x1b   : > { %s2734_s14 = scalar_lea.sflag [#allocation6], %s215_s30  ;;  %p3513_p7 = pneg %p2729_p5 }
  0x1c   : > { %s2368_s5 = scalar_lea.vmem %s226_s12, 32768  ;;  %s2589_s6 = smov [#allocation5]  }
  0x1d   : > { %p2369_p8 = scmp.ne.s32.totalorder %s226_s12, %s2368_s5 }
  0x1e   : > { %s224_s10 = scalar_lea.hbm %s3531_s2, %s1765_s7  ;;  %s2373_s7 = sshll.u32 %s2589_s6, 4  ;;  %s2374_s7 = int_to_ptr.vmem [resolvable:$false] %s2373_s7 }
  0x1f   : > { %p2371_p9 = pnand %p2369_p8, %p3513_p7  ;;  %s2375_s8 = scalar_lea.vmem %s2374_s7, 65536 }
  0x20   : > { %p2376_p11 = scmp.lt.s32.totalorder %s226_s12, %s2374_s7  ;;  %p2377_p12 = scmp.lt.s32.totalorder %s2375_s8, %s2368_s5 }
  0x21   : > { %p2372_p10 = pneg %p2371_p9 }
  0x22   : > { %p2378_p13 = por %p2377_p12, %p2376_p11 }
  0x24   : > { %p2379_p1 = pnand %p2378_p13, %p2372_p10 }
  0x26   : > { %2382 = shalt.err (!%p2379_p1)
}
  0x27   : > { %s2590_s9 = smov 256   ;;  %s3509_s30 = smov 128  }
  0x28   : > { %s3510_s5 = smov 8   ;;  %p250_p4 = scmp.lt.s32.totalorder %s2587_s28, 5 }
  0x29   : > { %2148 = dma.hbm_to_vmem [thread:$0]  (!%p2729_p5), %s224_s10, 32768, %s226_s12, %s2734_s14, %s2590_s9, %s3509_s30, %s3510_s5  }
  0x2a   : > { %p2749_p8 = pnand %p1767_p6, %p250_p4  ;;  %s2754_s6 = sadd.s32 4294967295, %s2587_s28  }
  0x2b   : > { %s1758_s7 = sadd.s32 4294967294, %s2587_s28   ;;  %s32_s8 = sadd.s32 1, %s2579_s26 }
  0x2c   : > { %s35_s29 = sadd.s32 1, %s2583_s27  ;;  %p33_p9 = scmp.ge.s32.totalorder %s32_s8, 2 }
  0x2d   : > { %s68_s2 = sadd.s32 1, %s2567_s23  ;;  %p75_p10 = scmp.ne.s32.totalorder %s2567_s23, %s2563_s22 }
  0x2e   : > { %p81_p11 = scmp.ne.s32.totalorder %s2563_s22, %s2559_s21  ;;  %s3579_s8 = smov (%p33_p9, %s32_s8), 0 }
  0x2f   : > { %3534 = sst [smem:[#allocation18_spill]] %s3579_s8  ;;  %s3581_s29 = smov (!%p33_p9, %s35_s29), %s2583_s27 }
  0x30   : > { %s65_s10 = ssub.s32 %s2579_s26, %s3579_s8  ;;  %p2771_p6 = por %p76_p0, %p75_p10 }
  0x31   : > { %p37_p12 = scmp.ge.s32.totalorder %s3581_s29, 2  ;;  %p66_p13 = scmp.eq.s32.totalorder %s65_s10, 0 }
  0x32   : > { %p82_p1 = scmp.eq.s32.totalorder %s2754_s6, 0  ;;  %s148_s21 = sadd.s32 1, %s2543_s17 }
  0x33   : > { %s3583_s29 = smov (%p37_p12, %s3581_s29), 0  ;;  %p158_p10 = scmp.ne.s32.totalorder %s2543_s17, %s2539_s16 }
  0x34   : > { %3536 = sst [smem:[#allocation19_spill]] %s3583_s29  ;;  %p2782_p4 = por %p82_p1, %p81_p11 }
  0x35   : > { %s2780_s9 = scalar_select %p66_p13, %s2567_s23, %s68_s2  }
  0x36   : > { %s91_s5 = ssub.s32 %s2583_s27, %s3583_s29  ;;  %p2791_p9 = por %p107_p2, %p82_p1 }
  0x37   : > { %3537 = sst [smem:[#allocation20_spill]] %s2780_s9  ;;  %p92_p0 = scmp.eq.s32.totalorder %s91_s5, 0 }
  0x38   : > { %s145_s4 = sor.u32 %s91_s5, %s65_s10  ;;  %s3540_s25 = sadd.s32 1, %s2555_s20 }
  0x39   : > { %s2800_s0 = scalar_select %p92_p0, %s2555_s20, %s3540_s25  }
  0x3a   : > { %p146_p12 = scmp.eq.s32.totalorder %s145_s4, 0  ;;  %p159_p11 = scmp.eq.s32.totalorder %s2754_s6, 3 }
  0x3b   : > { %3541 = sst [smem:[#allocation21_spill]] %s2800_s0  ;;  %p164_p13 = scmp.ne.s32.totalorder %s2539_s16, %s2535_s15 }
  0x3c   : > { %p165_p7 = scmp.eq.s32.totalorder %s1758_s7, 3  ;;  %p2808_p3 = por %p159_p11, %p158_p10 }
  0x3d   : > { %s2806_s2 = scalar_select %p146_p12, %s2543_s17, %s148_s21  }
  0x3e   : > { %p2812_p2 = por %p165_p7, %p164_p13  ;;  %s194_s5 = sand.u32 1, %s2567_s23  }
  0x3f   : > { %3542 = sst [smem:[#allocation22_spill]] %s2806_s2  ;;  %s1780_s10 = sshll.u32 %s2579_s26, 9 }
  0x40   : > { %s3544_s29 = scalar_select %p2812_p2, 1, 0 }
  0x41   : > { %s1761_s9 = sshll.u32 %s194_s5, 5  ;;  %s3545_s1 = sld [smem:[#allocation24_spill]] }
  0x42   : > { %s198_s24 = scalar_lea.vmem [#allocation2], %s1761_s9  ;;  %p3546_p1 = scmp.lt.s32.totalorder %s2587_s28, 4 }
  0x43   : > { %s205_s15 = sshll.u32 %s198_s24, 4  ;;  %s1766_s21 = sshll.u32 %s2583_s27, 4  ;;  %s206_s15 = int_to_ptr.vmem [resolvable:$true] %s205_s15 }
  0x44   : > { %p2825_p0 = pnand %p3546_p1, %p2771_p6  ;;  %s195_s2 = scalar_lea.sflag [#allocation3], %s194_s5 }
  0x45   : > { %s2396_s26 = scalar_lea.vmem %s206_s15, 512  ;;  %s2593_s0 = smov [#allocation2]  }
  0x46   : > { %p2385_p7 = pneg %p2825_p0  ;;  %p2397_p10 = scmp.ne.s32.totalorder %s206_s15, %s2396_s26 }
  0x47   : > { %s204_s4 = scalar_lea.hbm %s3545_s1, %s1780_s10  ;;  %s2401_s10 = sshll.u32 %s2593_s0, 4  ;;  %s2402_s10 = int_to_ptr.vmem [resolvable:$false] %s2401_s10 }
  0x48   : > { %p2399_p12 = pnand %p2397_p10, %p2385_p7  ;;  %s2403_s24 = scalar_lea.vmem %s2402_s10, 1024 }
  0x49   : > { %p2404_p13 = scmp.lt.s32.totalorder %s206_s15, %s2402_s10  ;;  %p2405_p2 = scmp.lt.s32.totalorder %s2403_s24, %s2396_s26 }
  0x4a   : > { %p2400_p11 = pneg %p2399_p12 }
  0x4b   : > { %p2406_p6 = por %p2405_p2, %p2404_p13 }
  0x4d   : > { %p2407_p1 = pnand %p2406_p6, %p2400_p11 }
  0x4f   : > { %2410 = shalt.err (!%p2407_p1)
}
  0x50   : > { %s3548_s12 = smov 8   ;;  %s3549_s9 = smov 128  }
  0x51   : > { %2145 = dma.hbm_to_vmem [thread:$0]  (!%p2825_p0), %s204_s4, 512, %s206_s15, %s195_s2, %s3549_s9, %s3549_s9, %s3548_s12  }
  0x52   : > { %s243_s1 = scalar_lea.hbm %s3506_s3, %s1766_s21  ;;  %s3550_s0 = sand.u32 1, %s2555_s20  }
  0x53   : > { %s238_s27 = scalar_lea.vmem [#allocation7], %s3550_s0  ;;  %p3551_p7 = pneg %p2729_p5 }
  0x54   : > { %s245_s23 = sshll.u32 %s238_s27, 4  ;;  %s2594_s7 = smov [#allocation7]   ;;  %s246_s23 = int_to_ptr.vmem [resolvable:$true] %s245_s23 }
  0x55   : > { %s2424_s26 = scalar_lea.vmem %s246_s23, 16  ;;  %s2429_s10 = sshll.u32 %s2594_s7, 4  ;;  %s2430_s10 = int_to_ptr.vmem [resolvable:$false] %s2429_s10 }
  0x56   : > { %p2425_p2 = scmp.ne.s32.totalorder %s246_s23, %s2424_s26  ;;  %s2431_s24 = scalar_lea.vmem %s2430_s10, 32 }
  0x57   : > { %p2432_p11 = scmp.lt.s32.totalorder %s246_s23, %s2430_s10  ;;  %p2433_p0 = scmp.lt.s32.totalorder %s2431_s24, %s2424_s26 }
  0x58   : > { %p2427_p10 = pnand %p2425_p2, %p3551_p7 }
  0x59   : > { %p2434_p13 = por %p2433_p0, %p2432_p11 }
  0x5a   : > { %p2428_p12 = pneg %p2427_p10 }
  0x5c   : > { %p2435_p6 = pnand %p2434_p13, %p2428_p12 }
  0x5e   : > { %2438 = shalt.err (!%p2435_p6)
}
  0x5f   : > { %2151 = dma.hbm_to_vmem [thread:$0]  (!%p2729_p5), %s243_s1, 16, %s246_s23, %s2734_s14  }
  0x60   : > { %254 = sbr.rel (%p2749_p8) target bundleno = 665 (0x299), region = 36  ;;  %s256_s15 = sand.u32 (!%p2749_p8), 1, %s2563_s22  }
  0x61   : > { %s1768_s27 = sshll.u32 (!%p2749_p8), %s256_s15, 5  ;;  %s257_s2 = scalar_lea.sflag (!%p2749_p8), [#allocation3], %s256_s15 }
  0x62   : > { %s2851_s4 = scalar_lea.vmem (!%p2749_p8), [#allocation2], %s1768_s27 }
  0x65   : > { %2522 = dma.done.wait (%p2782_p4), %s257_s2, 512  }
  0x66   : > { %2524 = vsyncadd (%p2782_p4), %s257_s2, 4294966784  ;;  %s265_s1 = sand.u32 1, %s2754_s6   ;;  %s267_s23 = sand.u32 1, %s2551_s19  }
  0x67   : > { %s1769_s13 = sshll.u32 %s267_s23, 11  ;;  %s266_s14 = scalar_lea.sflag [#allocation6], %s265_s1 }
  0x68   : > { %s2861_s11 = scalar_lea.vmem [#allocation5], %s1769_s13 }
  0x69   : > { %2526 = dma.done.wait (%p2791_p9), %s266_s14, 32784  }
  0x6a   : > { %2528 = vsyncadd (%p2791_p9), %s266_s14, 4294934512  ;;  %s3552_s21 = sld [smem:[#allocation14_spill]]  ;;  %v2595_v0 = vmov 3   ;;  %v2596_v1 = vmov 1   ;;  %v719_v3 = vld [vmem:[%s2861_s11 + $0x1f8] sm:$0xff]  ;;  %v718_v5 = vld [vmem:[%s2861_s11 + $0x1f0] sm:$0xff] }
  0x6b   : > { %2293 = vset.pattern.permute.xlu1 %v2595_v0  ;;  %2292 = vset.pattern.permute.xlu0 %v2596_v1  ;;  %s3553_s8 = sld [smem:[#allocation23_spill]]  ;;  %v703_v4 = vld [vmem:[%s2861_s11 + $0x178] sm:$0xff]  ;;  %v702_v7 = vld [vmem:[%s2861_s11 + $0x170] sm:$0xff]  ;;  %v2597_v9 = vmov 2   ;;  %v717_v10 = vld [vmem:[%s2861_s11 + $0x1e8] sm:$0xff]  ;;  %v2598_v23 = vmov 0  }
  0x6c   : > { %1826 = vmatprep.subr.mxu1 %v719_v3  ;;  %v687_v8 = vld [vmem:[%s2861_s11 + $0xf8] sm:$0xff]  ;;  %v701_v12 = vld [vmem:[%s2861_s11 + $0x168] sm:$0xff]  ;;  %v686_v13 = vld [vmem:[%s2861_s11 + $0xf0] sm:$0xff]  ;;  %v2599_v42 = vmov 7   ;;  %v2600_v49 = vmov 4   ;;  %v2601_v56 = vmov 5  }
  0x6d   : > { %1827 = vmatpush3.msra.mxu1 %v703_v4  ;;  %v671_v11 = vld [vmem:[%s2861_s11 + $0x78] sm:$0xff]  ;;  %1782 = vmatprep.subr.mxu0 %v687_v8  ;;  %v716_v15 = vld [vmem:[%s2861_s11 + $0x1e0] sm:$0xff]  ;;  %v670_v16 = vld [vmem:[%s2861_s11 + $0x70] sm:$0xff]  ;;  %s277_s25 = scalar_lea.vmem [#allocation7], %s267_s23  ;;  %s313_s0 = sand.u32 1, %s2539_s16  }
  0x6e   : > { %1828 = vmatprep.subr.mxu1 %v718_v5  ;;  %1783 = vmatpush3.msra.mxu0 %v671_v11  ;;  %v700_v17 = vld [vmem:[%s2861_s11 + $0x160] sm:$0xff]  ;;  %v685_v18 = vld [vmem:[%s2861_s11 + $0xe8] sm:$0xff]  ;;  %v715_v19 = vld [vmem:[%s2861_s11 + $0x1d8] sm:$0xff]  ;;  %s1770_s26 = sshll.u32 %s313_s0, 5  ;;  %s3554_s10 = sld [smem:[#allocation15_spill]] }
  0x6f   : > { %1829 = vmatpush3.msra.mxu1 %v702_v7  ;;  %1784 = vmatprep.subr.mxu0 %v686_v13  ;;  %v669_v20 = vld [vmem:[%s2861_s11 + $0x68] sm:$0xff]  ;;  %v699_v21 = vld [vmem:[%s2861_s11 + $0x158] sm:$0xff]  ;;  %v684_v22 = vld [vmem:[%s2861_s11 + $0xe0] sm:$0xff]  ;;  %v2602_v7 = vmov 6   ;;  %s3393_s7 = scalar_lea.vmem [#allocation8], %s1770_s26  ;;  %s3555_s23 = sld [smem:[#allocation26_spill]] }
  0x70   : > { %s1771_s30 = sshll.u32 %s3552_s21, 2  ;;  %1830 = vmatprep.subr.mxu1 %v717_v10  ;;  %1785 = vmatpush3.msra.mxu0 %v670_v16  ;;  %v714_v24 = vld [vmem:[%s2861_s11 + $0x1d0] sm:$0xff]  ;;  %v668_v25 = vld [vmem:[%s2861_s11 + $0x60] sm:$0xff]  ;;  %v683_v27 = vld [vmem:[%s2861_s11 + $0xd8] sm:$0xff]  ;;  %s1781_s24 = sshll.u32 %s3552_s21, 3 }
  0x71   : > { %p317_p5 = scmp.lt.s32.totalorder %s1771_s30, 7  ;;  %1831 = vmatpush3.msra.mxu1 %v701_v12  ;;  %1786 = vmatprep.subr.mxu0 %v685_v18  ;;  %v698_v26 = vld [vmem:[%s2861_s11 + $0x150] sm:$0xff]  ;;  %v713_v28 = vld [vmem:[%s2861_s11 + $0x1c8] sm:$0xff]  ;;  %v667_v30 = vld [vmem:[%s2861_s11 + $0x58] sm:$0xff]  ;;  %v2604_v18 = vmov 9   ;;  %s1619_s27 = sshll.u32 %s3393_s7, 4  ;;  %s3418_s27 = int_to_ptr.vmem [resolvable:$true] %s1619_s27 }
  0x72   : > { %1832 = vmatprep.subr.mxu1 %v716_v15  ;;  %1787 = vmatpush3.msra.mxu0 %v669_v20  ;;  %v697_v29 = vld [vmem:[%s2861_s11 + $0x148] sm:$0xff]  ;;  %v712_v31 = vld [vmem:[%s2861_s11 + $0x1c0] sm:$0xff]  ;;  %v682_v32 = vld [vmem:[%s2861_s11 + $0xd0] sm:$0xff]  ;;  %v2606_v20 = vmov 11   ;;  %s2439_s21 = scalar_lea.vmem %s3418_s27, 512 }
  0x73   : > { %s3585_s30 = smov (!%p317_p5, %s1771_s30), 7  ;;  %1833 = vmatpush3.msra.mxu1 %v700_v17  ;;  %1788 = vmatprep.subr.mxu0 %v684_v22  ;;  %v696_v34 = vld [vmem:[%s2861_s11 + $0x140] sm:$0xff]  ;;  %v711_v35 = vld [vmem:[%s2861_s11 + $0x1b8] sm:$0xff]  ;;  %v710_v37 = vld [vmem:[%s2861_s11 + $0x1b0] sm:$0xff]  ;;  %v2603_v17 = vmov 8   ;;  %v2608_v22 = vmov 13   ;;  %p2440_p8 = scmp.ne.s32.totalorder %s3418_s27, %s2439_s21 }
  0x74   : > { %s1772_s6 = sshll.u32 %s3585_s30, 3  ;;  %1834 = vmatprep.subr.mxu1 %v715_v19  ;;  %1789 = vmatpush3.msra.mxu0 %v668_v25  ;;  %v695_v36 = vld [vmem:[%s2861_s11 + $0x138] sm:$0xff]  ;;  %v666_v38 = vld [vmem:[%s2861_s11 + $0x50] sm:$0xff]  ;;  %v709_v40 = vld [vmem:[%s2861_s11 + $0x1a8] sm:$0xff]  ;;  %v2605_v19 = vmov 10   ;;  %s1616_s15 = sadd.s32 %s3554_s10, %s1781_s24 }
  0x75   : > { %s2873_s5 = scalar_lea.vmem %s3553_s8, %s1772_s6  ;;  %1835 = vmatpush3.msra.mxu1 %v699_v21  ;;  %1790 = vmatprep.subr.mxu0 %v683_v27  ;;  %v694_v39 = vld [vmem:[%s2861_s11 + $0x130] sm:$0xff]  ;;  %v693_v41 = vld [vmem:[%s2861_s11 + $0x128] sm:$0xff]  ;;  %v708_v44 = vld [vmem:[%s2861_s11 + $0x1a0] sm:$0xff]  ;;  %v2607_v21 = vmov 12   ;;  %s1777_s2 = sshll.u32 %s1616_s15, 7 }
  0x76   : > { %v2876_v2 = vld [vmem:[%s2873_s5] sm:$0xff]  ;;  %v2884_v6 = vld [vmem:[%s2873_s5 + $0x8] sm:$0xff]  ;;  %v2897_v14 = vld [vmem:[%s2873_s5 + $0x10] sm:$0xff]  ;;  %1836 = vmatprep.subr.mxu1 %v714_v24  ;;  %1791 = vmatpush3.msra.mxu0 %v667_v30  ;;  %v2610_v24 = vmov 15   ;;  %s3556_s13 = smov %s3555_s23  ;;  %s3423_s14 = scalar_lea.hbm %s3555_s23, %s1777_s2 }
  0x77   : > { %397 = vperm.xlu1 %2293, %v2876_v2   ;;  %357 = vperm.xlu0 %2292, %v2876_v2   ;;  %v2927_v33 = vld [vmem:[%s2873_s5 + $0x18] sm:$0xff]  ;;  %v681_v43 = vld [vmem:[%s2861_s11 + $0xc8] sm:$0xff]  ;;  %v692_v46 = vld [vmem:[%s2861_s11 + $0x120] sm:$0xff]  ;;  %p2441_p4 = pnand %p2440_p8, %p2808_p3  ;;  %s2611_s30 = smov [#allocation8]  }
  0x78   : > { %1837 = vmatpush3.msra.mxu1 %v698_v26  ;;  %1792 = vmatprep.subr.mxu0 %v682_v32  ;;  %v665_v45 = vld [vmem:[%s2861_s11 + $0x48] sm:$0xff]  ;;  %v680_v47 = vld [vmem:[%s2861_s11 + $0xc0] sm:$0xff]  ;;  %v707_v48 = vld [vmem:[%s2861_s11 + $0x198] sm:$0xff]  ;;  %s2443_s6 = sshll.u32 %s2611_s30, 4  ;;  %s2444_s6 = int_to_ptr.vmem [resolvable:$false] %s2443_s6 }
  0x79   : > { %1838 = vmatprep.subr.mxu1 %v713_v28  ;;  %1793 = vmatpush3.msra.mxu0 %v666_v38  ;;  %v664_v50 = vld [vmem:[%s2861_s11 + $0x40] sm:$0xff]  ;;  %v691_v51 = vld [vmem:[%s2861_s11 + $0x118] sm:$0xff]  ;;  %v706_v53 = vld [vmem:[%s2861_s11 + $0x190] sm:$0xff]  ;;  %p2442_p9 = pneg %p2441_p4  ;;  %s2445_s12 = scalar_lea.vmem %s2444_s6, 1024 }
  0x7a   : > { %1839 = vmatpush3.msra.mxu1 %v697_v29  ;;  %1794 = vmatprep.subr.mxu0 %v681_v43  ;;  %v679_v52 = vld [vmem:[%s2861_s11 + $0xb8] sm:$0xff]  ;;  %v690_v55 = vld [vmem:[%s2861_s11 + $0x110] sm:$0xff]  ;;  %v705_v58 = vld [vmem:[%s2861_s11 + $0x188] sm:$0xff]  ;;  %p2446_p1 = scmp.lt.s32.totalorder %s3418_s27, %s2444_s6  ;;  %p2447_p2 = scmp.lt.s32.totalorder %s2445_s12, %s2439_s21 }
  0x7b   : > { %2294 = vset.pattern.permute.xlu1 %v2597_v9  ;;  %2297 = vset.pattern.permute.xlu0 %v2597_v9  ;;  %v663_v54 = vld [vmem:[%s2861_s11 + $0x38] sm:$0xff]  ;;  %v678_v57 = vld [vmem:[%s2861_s11 + $0xb0] sm:$0xff]  ;;  %v689_v60 = vld [vmem:[%s2861_s11 + $0x108] sm:$0xff] }
  0x7c   : > { %377 = vperm.xlu1 %2294, %v2876_v2   ;;  %381 = vperm.xlu0 %2297, %v2884_v6   ;;  %v662_v59 = vld [vmem:[%s2861_s11 + $0x30] sm:$0xff]  ;;  %v677_v61 = vld [vmem:[%s2861_s11 + $0xa8] sm:$0xff]  ;;  %v704_v62 = vld [vmem:[%s2861_s11 + $0x180] sm:$0xff]  ;;  %p2448_p7 = por %p2447_p2, %p2446_p1 }
  0x7d   : > { %1840 = vmatprep.subr.mxu1 %v712_v31  ;;  %1795 = vmatpush3.msra.mxu0 %v665_v45  ;;  %v661_v63 = vld [vmem:[%s2861_s11 + $0x28] sm:$0xff]  ;;  %v660_v3 = vld [vmem:[%s2861_s11 + $0x20] sm:$0xff]  ;;  %v675_v4 = vld [vmem:[%s2861_s11 + $0x98] sm:$0xff] }
  0x7e   : > { %1841 = vmatpush3.msra.mxu1 %v696_v34  ;;  %1796 = vmatprep.subr.mxu0 %v680_v47  ;;  %v783_v5 = vld [vmem:[%s2861_s11 + $0x3f8] sm:$0xff]  ;;  %v674_v10 = vld [vmem:[%s2861_s11 + $0x90] sm:$0xff]  ;;  %v673_v11 = vld [vmem:[%s2861_s11 + $0x88] sm:$0xff]  ;;  %p2449_p10 = pnand %p2448_p7, %p2442_p9 }
  0x7f   : > { %1842 = vmatprep.subr.mxu1 %v711_v35  ;;  %1797 = vmatpush3.msra.mxu0 %v664_v50  ;;  %v659_v8 = vld [vmem:[%s2861_s11 + $0x18] sm:$0xff]  ;;  %v657_v12 = vld [vmem:[%s2861_s11 + $0x8] sm:$0xff]  ;;  %v672_v13 = vld [vmem:[%s2861_s11 + $0x80] sm:$0xff] }
  0x80   : > { %2295 = vset.pattern.permute.xlu1 %v2596_v1  ;;  %2300 = vset.pattern.permute.xlu0 %v2595_v0  ;;  %v656_v15 = vld [vmem:[%s2861_s11] sm:$0xff]  ;;  %v751_v16 = vld [vmem:[%s2861_s11 + $0x2f8] sm:$0xff]  ;;  %v782_v35 = vld [vmem:[%s2861_s11 + $0x3f0] sm:$0xff] }
  0x81   : > { %361 = vperm.xlu1 %2295, %v2884_v6   ;;  %405 = vperm.xlu0 %2300, %v2897_v14   ;;  %v3035_v25 = vld [vmem:[%s2851_s4] sm:$0xff]  ;;  %v767_v34 = vld [vmem:[%s2861_s11 + $0x378] sm:$0xff] }
  0x82   : > { %1843 = vmatpush3.msra.mxu1 %v695_v36  ;;  %1798 = vmatprep.subr.mxu0 %v679_v52  ;;  %v766_v36 = vld [vmem:[%s2861_s11 + $0x370] sm:$0xff]  ;;  %v779_v43 = vld [vmem:[%s2861_s11 + $0x3d8] sm:$0xff] }
  0x83   : > { %1844 = vmatprep.subr.mxu1 %v710_v37  ;;  %1799 = vmatpush3.msra.mxu0 %v663_v54  ;;  %v781_v37 = vld [vmem:[%s2861_s11 + $0x3e8] sm:$0xff]  ;;  %v763_v45 = vld [vmem:[%s2861_s11 + $0x358] sm:$0xff]  ;;  %v3066_v54 = vld [vmem:[%s2851_s4 + $0x10] sm:$0xff] }
  0x84   : > { %1845 = vmatpush3.msra.mxu1 %v694_v39  ;;  %1800 = vmatprep.subr.mxu0 %v678_v57 }
  0x85   : > { %2296 = vset.pattern.permute.xlu1 %v2595_v0  ;;  %2301 = vset.pattern.permute.xlu0 %v2598_v23 }
  0x86   : > { %401 = vperm.xlu1 %2296, %v2884_v6   ;;  %334 = vperm.xlu0 %2301, %v2876_v2  }
  0x87   : > { %1846 = vmatprep.subr.mxu1 %v709_v40  ;;  %1801 = vmatpush3.msra.mxu0 %v662_v59  ;;  %v765_v40 = vld [vmem:[%s2861_s11 + $0x368] sm:$0xff] }
  0x88   : > { %1847 = vmatpush3.msra.mxu1 %v693_v41  ;;  %1802 = vmatprep.subr.mxu0 %v677_v61  ;;  %v780_v41 = vld [vmem:[%s2861_s11 + $0x3e0] sm:$0xff] }
  0x89   : > { %1848 = vmatprep.subr.mxu1 %v708_v44  ;;  %1803 = vmatpush3.msra.mxu0 %v661_v63  ;;  %v3054_v44 = vld [vmem:[%s2851_s4 + $0x8] sm:$0xff]  ;;  %v748_v63 = vld [vmem:[%s2861_s11 + $0x2e0] sm:$0xff] }
  0x8a   : > { %2298 = vset.pattern.permute.xlu1 %v2596_v1  ;;  %339 = vperm.xlu0 %2301, %v2884_v6  }
  0x8b   : > { %365 = vperm.xlu1 %2298, %v2897_v14   ;;  %1849 = vmatpush3.msra.mxu1 %v692_v46 }
  0x8c   : > { %1850 = vmatprep.subr.mxu1 %v707_v48 }
  0x8d   : > { %1851 = vmatpush3.msra.mxu1 %v691_v51  ;;  %v735_v51 = vld [vmem:[%s2861_s11 + $0x278] sm:$0xff] }
  0x8e   : > { %349 = vperm.xlu0 %2301, %v2927_v33   ;;  %1852 = vmatprep.subr.mxu1 %v706_v53  ;;  %v750_v53 = vld [vmem:[%s2861_s11 + $0x2f0] sm:$0xff] }
  0x8f   : > { %2299 = vset.pattern.permute.xlu1 %v2598_v23  ;;  %1853 = vmatpush3.msra.mxu1 %v690_v55  ;;  %v2609_v23 = vmov 14   ;;  %v734_v55 = vld [vmem:[%s2861_s11 + $0x270] sm:$0xff] }
  0x90   : > { %344 = vperm.xlu1 %2299, %v2897_v14   ;;  %1854 = vmatprep.subr.mxu1 %v705_v58 }
  0x91   : > { %1855 = vmatpush3.msra.mxu1 %v689_v60  ;;  %v749_v60 = vld [vmem:[%s2861_s11 + $0x2e8] sm:$0xff] }
  0x92   : > { %2310 = vset.pattern.permute.xlu0 %v2599_v42  ;;  %1856 = vmatprep.subr.mxu1 %v704_v62  ;;  %v733_v62 = vld [vmem:[%s2861_s11 + $0x268] sm:$0xff] }
  0x93   : > { %481 = vperm.xlu0 %2310, %v2884_v6  }
  0x94   : > { %2302 = vset.pattern.permute.xlu1 %v2597_v9 }
  0x95   : > { %385 = vperm.xlu1 %2302, %v2897_v14  }
  0x97   : > { %2313 = vset.pattern.permute.xlu0 %v2600_v49 }
  0x98   : > { %425 = vperm.xlu0 %2313, %v2897_v14  }
  0x99   : > { %2303 = vset.pattern.permute.xlu1 %v2596_v1  ;;  %v688_v1 = vld [vmem:[%s2861_s11 + $0x100] sm:$0xff] }
  0x9a   : > { %369 = vperm.xlu1 %2303, %v2927_v33   ;;  %1857 = vmatpush3.msra.mxu1 %v688_v1  ;;  %v778_v1 = vld [vmem:[%s2861_s11 + $0x3d0] sm:$0xff] }
  0x9b   : > { %1914 = vmatprep.subr.mxu1 %v783_v5 }
  0x9c   : > { %2314 = vset.pattern.permute.xlu0 %v2601_v56 }
  0x9d   : > { %437 = vperm.xlu0 %2314, %v2876_v2  }
  0x9e   : > { %2304 = vset.pattern.permute.xlu1 %v2595_v0  ;;  %v676_v0 = vld [vmem:[%s2861_s11 + $0xa0] sm:$0xff] }
  0x9f   : > { %409 = vperm.xlu1 %2304, %v2927_v33   ;;  %1804 = vmatprep.subr.mxu0 %v676_v0  ;;  %v732_v0 = vld [vmem:[%s2861_s11 + $0x260] sm:$0xff] }
  0xa0   : > { %1805 = vmatpush3.msra.mxu0 %v660_v3  ;;  %v747_v3 = vld [vmem:[%s2861_s11 + $0x2d8] sm:$0xff] }
  0xa1   : > { %449 = vperm.xlu0 %2314, %v2927_v33   ;;  %1806 = vmatprep.subr.mxu0 %v675_v4 }
  0xa2   : > { %1807 = vmatpush3.msra.mxu0 %v659_v8 }
  0xa3   : > { %2305 = vset.pattern.permute.xlu1 %v2597_v9  ;;  %v658_v9 = vld [vmem:[%s2861_s11 + $0x10] sm:$0xff]  ;;  %1808 = vmatprep.subr.mxu0 %v674_v10  ;;  %v731_v10 = vld [vmem:[%s2861_s11 + $0x258] sm:$0xff] }
  0xa4   : > { %389 = vperm.xlu1 %2305, %v2927_v33   ;;  %1809 = vmatpush3.msra.mxu0 %v658_v9  ;;  %v777_v9 = vld [vmem:[%s2861_s11 + $0x3c8] sm:$0xff] }
  0xa5   : > { %2317 = vset.pattern.permute.xlu0 %v2602_v7  ;;  %1810 = vmatprep.subr.mxu0 %v673_v11  ;;  %v746_v11 = vld [vmem:[%s2861_s11 + $0x2d0] sm:$0xff] }
  0xa6   : > { %457 = vperm.xlu0 %2317, %v2876_v2   ;;  %1811 = vmatpush3.msra.mxu0 %v657_v12  ;;  %v761_v12 = vld [vmem:[%s2861_s11 + $0x348] sm:$0xff] }
  0xa7   : > { %1812 = vmatprep.subr.mxu0 %v672_v13  ;;  %v730_v13 = vld [vmem:[%s2861_s11 + $0x250] sm:$0xff] }
  0xa8   : > { %2306 = vset.pattern.permute.xlu1 %v2600_v49  ;;  %1813 = vmatpush3.msra.mxu0 %v656_v15  ;;  %v745_v15 = vld [vmem:[%s2861_s11 + $0x2c8] sm:$0xff] }
  0xa9   : > { %417 = vperm.xlu1 %2306, %v2876_v2   ;;  %1870 = vmatprep.subr.mxu0 %v751_v16 }
  0xaa   : > { %469 = vperm.xlu0 %2317, %v2927_v33  }
  0xad   : > { %2307 = vset.pattern.permute.xlu1 %v2599_v42 }
  0xae   : > { %477 = vperm.xlu1 %2307, %v2876_v2   ;;  %2324 = vset.pattern.permute.xlu0 %v2603_v17 }
  0xaf   : > { %501 = vperm.xlu0 %2324, %v2884_v6  }
  0xb2   : > { %2308 = vset.pattern.permute.xlu1 %v2601_v56 }
  0xb3   : > { %441 = vperm.xlu1 %2308, %v2884_v6   ;;  %2327 = vset.pattern.permute.xlu0 %v2604_v18 }
  0xb4   : > { %525 = vperm.xlu0 %2327, %v2897_v14  }
  0xb7   : > { %2309 = vset.pattern.permute.xlu1 %v2600_v49 }
  0xb8   : > { %421 = vperm.xlu1 %2309, %v2884_v6   ;;  %2330 = vset.pattern.permute.xlu0 %v2605_v19 }
  0xb9   : > { %545 = vperm.xlu0 %2330, %v2897_v14  }
  0xbc   : > { %2311 = vset.pattern.permute.xlu1 %v2602_v7 }
  0xbd   : > { %461 = vperm.xlu1 %2311, %v2884_v6   ;;  %2331 = vset.pattern.permute.xlu0 %v2606_v20 }
  0xbe   : > { %557 = vperm.xlu0 %2331, %v2876_v2  }
  0xc1   : > { %2312 = vset.pattern.permute.xlu1 %v2601_v56 }
  0xc2   : > { %445 = vperm.xlu1 %2312, %v2897_v14   ;;  %569 = vperm.xlu0 %2331, %v2927_v33  }
  0xc6   : > { %2315 = vset.pattern.permute.xlu1 %v2599_v42  ;;  %2336 = vset.pattern.permute.xlu0 %v2607_v21 }
  0xc7   : > { %485 = vperm.xlu1 %2315, %v2897_v14   ;;  %577 = vperm.xlu0 %2336, %v2876_v2  }
  0xcb   : > { %2316 = vset.pattern.permute.xlu1 %v2602_v7  ;;  %2339 = vset.pattern.permute.xlu0 %v2608_v22  ;;  %v762_v7 = vld [vmem:[%s2861_s11 + $0x350] sm:$0xff] }
  0xcc   : > { %465 = vperm.xlu1 %2316, %v2897_v14   ;;  %601 = vperm.xlu0 %2339, %v2884_v6  }
  0xd0   : > { %2318 = vset.pattern.permute.xlu1 %v2600_v49  ;;  %2342 = vset.pattern.permute.xlu0 %v2609_v23 }
  0xd1   : > { %429 = vperm.xlu1 %2318, %v2927_v33   ;;  %621 = vperm.xlu0 %2342, %v2884_v6  }
  0xd5   : > { %2319 = vset.pattern.permute.xlu1 %v2599_v42  ;;  %2345 = vset.pattern.permute.xlu0 %v2610_v24  ;;  %v764_v42 = vld [vmem:[%s2861_s11 + $0x360] sm:$0xff] }
  0xd6   : > { %489 = vperm.xlu1 %2319, %v2927_v33   ;;  %645 = vperm.xlu0 %2345, %v2897_v14  }
  0xda   : > { %2320 = vset.pattern.permute.xlu1 %v2604_v18  ;;  %2348 = vset.pattern.permute.xlu0 %v2607_v21 }
  0xdb   : > { %517 = vperm.xlu1 %2320, %v2876_v2   ;;  %589 = vperm.xlu0 %2348, %v2927_v33  }
  0xdf   : > { %2321 = vset.pattern.permute.xlu1 %v2603_v17  ;;  %2351 = vset.pattern.permute.xlu0 %v2610_v24 }
  0xe0   : > { %497 = vperm.xlu1 %2321, %v2876_v2  }
  0xe4   : > { %2322 = vset.pattern.permute.xlu1 %v2605_v19 }
  0xe5   : > { %537 = vperm.xlu1 %2322, %v2876_v2  }
  0xe9   : > { %2323 = vset.pattern.permute.xlu1 %v2604_v18 }
  0xea   : > { %521 = vperm.xlu1 %2323, %v2884_v6  }
  0xee   : > { %2325 = vset.pattern.permute.xlu1 %v2606_v20 }
  0xef   : > { %561 = vperm.xlu1 %2325, %v2884_v6  }
  0xf2   : > { %v398_v26 = vpop.permute.xlu1 %397  ;;  %v358_v27 = vpop.permute.xlu0 %357 }
  0xf3   : > { %2326 = vset.pattern.permute.xlu1 %v2605_v19  ;;  %v412_v28 = vmul.f32 %v398_v26, %v3035_v25  ;;  %v372_v29 = vmul.f32 %v358_v27, %v3035_v25  ;;  %v776_v26 = vld [vmem:[%s2861_s11 + $0x3c0] sm:$0xff] }
  0xf4   : > { %541 = vperm.xlu1 %2326, %v2884_v6   ;;  %v728_v27 = vld [vmem:[%s2861_s11 + $0x240] sm:$0xff] }
  0xf5   : > { %1068 = vmatprep.mubr.f32.mxu1 %v412_v28  ;;  %983 = vmatprep.mubr.f32.mxu0 %v372_v29  ;;  %v760_v28 = vld [vmem:[%s2861_s11 + $0x340] sm:$0xff]  ;;  %v3103_v29 = vld [vmem:[%s2851_s4 + $0x18] sm:$0xff] }
  0xf7   : > { %v378_v30 = vpop.permute.xlu1 %377  ;;  %v382_v31 = vpop.permute.xlu0 %381 }
  0xf8   : > { %v392_v32 = vmul.f32 %v378_v30, %v3035_v25  ;;  %2328 = vset.pattern.permute.xlu1 %v2603_v17  ;;  %v393_v48 = vmul.f32 %v382_v31, %v3054_v44  ;;  %v743_v30 = vld [vmem:[%s2861_s11 + $0x2b8] sm:$0xff] }
  0xf9   : > { %505 = vperm.xlu1 %2328, %v2897_v14   ;;  %v727_v31 = vld [vmem:[%s2861_s11 + $0x238] sm:$0xff] }
  0xfa   : > { %1069 = vmatmul.mubr.f32.vlgmr.msra.gmra.mxu1 %v392_v32 }
  0xfb   : > { %1915 = vmatpush3.msra.mxu1 %v767_v34  ;;  %v742_v34 = vld [vmem:[%s2861_s11 + $0x2b0] sm:$0xff] }
  0xfc   : > { %v362_v38 = vpop.permute.xlu1 %361  ;;  %v406_v39 = vpop.permute.xlu0 %405  ;;  %1916 = vmatprep.subr.mxu1 %v782_v35 }
  0xfd   : > { %2329 = vset.pattern.permute.xlu1 %v2606_v20  ;;  %1917 = vmatpush3.msra.mxu1 %v766_v36  ;;  %v373_v52 = vmul.f32 %v362_v38, %v3054_v44  ;;  %v414_v57 = vmul.f32 %v406_v39, %v3066_v54  ;;  %v744_v20 = vld [vmem:[%s2861_s11 + $0x2c0] sm:$0xff]  ;;  %v726_v36 = vld [vmem:[%s2861_s11 + $0x230] sm:$0xff]  ;;  %v741_v39 = vld [vmem:[%s2861_s11 + $0x2a8] sm:$0xff] }
  0xfe   : > { %565 = vperm.xlu1 %2329, %v2897_v14   ;;  %1918 = vmatprep.subr.mxu1 %v781_v37  ;;  %v775_v37 = vld [vmem:[%s2861_s11 + $0x3b8] sm:$0xff] }
  0xff   : > { %1919 = vmatpush3.msra.mxu1 %v765_v40  ;;  %v759_v40 = vld [vmem:[%s2861_s11 + $0x338] sm:$0xff] }
 0x100   : > { %1920 = vmatprep.subr.mxu1 %v780_v41  ;;  %v725_v41 = vld [vmem:[%s2861_s11 + $0x228] sm:$0xff] }
 0x101   : > { %v402_v46 = vpop.permute.xlu1 %401  ;;  %v335_v47 = vpop.permute.xlu0 %334  ;;  %1921 = vmatpush3.msra.mxu1 %v764_v42  ;;  %v740_v42 = vld [vmem:[%s2861_s11 + $0x2a0] sm:$0xff] }
 0x102   : > { %v413_v49 = vmul.f32 %v402_v46, %v3054_v44  ;;  %v352_v50 = vmul.f32 %v335_v47, %v3035_v25  ;;  %2332 = vset.pattern.permute.xlu1 %v2604_v18  ;;  %1922 = vmatprep.subr.mxu1 %v779_v43 }
 0x103   : > { %529 = vperm.xlu1 %2332, %v2927_v33   ;;  %1923 = vmatpush3.msra.mxu1 %v763_v45  ;;  %v724_v45 = vld [vmem:[%s2861_s11 + $0x220] sm:$0xff] }
 0x104   : > { %984 = vmatmul.mubr.f32.vlgmr.msra.gmra.mxu0 %v352_v50  ;;  %1073 = vmatprep.mubr.f32.mxu1 %v413_v49  ;;  %v739_v49 = vld [vmem:[%s2861_s11 + $0x298] sm:$0xff]  ;;  %v758_v50 = vld [vmem:[%s2861_s11 + $0x330] sm:$0xff] }
 0x105   : > { %988 = vmatprep.mubr.f32.mxu0 %v373_v52  ;;  %v340_v56 = vpop.permute.xlu0 %339  ;;  %1871 = vmatpush3.msra.mxu0 %v735_v51  ;;  %v723_v52 = vld [vmem:[%s2861_s11 + $0x218] sm:$0xff] }
 0x106   : > { %v353_v58 = vmul.f32 %v340_v56, %v3054_v44  ;;  %v366_v59 = vpop.permute.xlu1 %365  ;;  %1872 = vmatprep.subr.mxu0 %v750_v53  ;;  %1074 = vmatmul.mubr.f32.gmra.mxu1 %v393_v48  ;;  %v774_v48 = vld [vmem:[%s2861_s11 + $0x3b0] sm:$0xff]  ;;  %v773_v56 = vld [vmem:[%s2861_s11 + $0x3a8] sm:$0xff] }
 0x107   : > { %v374_v61 = vmul.f32 %v366_v59, %v3066_v54  ;;  %2333 = vset.pattern.permute.xlu1 %v2603_v17  ;;  %1873 = vmatpush3.msra.mxu0 %v734_v55  ;;  %v729_v17 = vld [vmem:[%s2861_s11 + $0x248] sm:$0xff]  ;;  %v738_v53 = vld [vmem:[%s2861_s11 + $0x290] sm:$0xff] }
 0x108   : > { %509 = vperm.xlu1 %2333, %v2927_v33   ;;  %989 = vmatmul.mubr.f32.gmra.mxu0 %v353_v58  ;;  %v757_v58 = vld [vmem:[%s2861_s11 + $0x328] sm:$0xff] }
 0x109   : > { %993 = vmatprep.mubr.f32.mxu0 %v374_v61  ;;  %1874 = vmatprep.subr.mxu0 %v749_v60  ;;  %v3080_v4 = vpop.permute.xlu0 %349  ;;  %v737_v59 = vld [vmem:[%s2861_s11 + $0x288] sm:$0xff]  ;;  %v772_v60 = vld [vmem:[%s2861_s11 + $0x3a0] sm:$0xff] }
 0x10a   : > { %1875 = vmatpush3.msra.mxu0 %v733_v62  ;;  %1078 = vmatprep.mubr.f32.mxu1 %v414_v57  ;;  %v355_v46 = vmul.f32 %v3080_v4, %v3103_v29  ;;  %v722_v57 = vld [vmem:[%s2861_s11 + $0x210] sm:$0xff]  ;;  %v756_v61 = vld [vmem:[%s2861_s11 + $0x320] sm:$0xff]  ;;  %v721_v62 = vld [vmem:[%s2861_s11 + $0x208] sm:$0xff] }
 0x10b   : > { %v345_v5 = vpop.permute.xlu1 %344  ;;  %1876 = vmatprep.subr.mxu0 %v748_v63  ;;  %1924 = vmatprep.subr.mxu1 %v778_v1  ;;  %v736_v1 = vld [vmem:[%s2861_s11 + $0x280] sm:$0xff] }
 0x10c   : > { %v354_v8 = vmul.f32 %v345_v5, %v3066_v54  ;;  %2334 = vset.pattern.permute.xlu1 %v2605_v19  ;;  %1877 = vmatpush3.msra.mxu0 %v732_v0  ;;  %v755_v5 = vld [vmem:[%s2861_s11 + $0x318] sm:$0xff] }
 0x10d   : > { %549 = vperm.xlu1 %2334, %v2927_v33   ;;  %1878 = vmatprep.subr.mxu0 %v747_v3  ;;  %v771_v3 = vld [vmem:[%s2861_s11 + $0x398] sm:$0xff] }
 0x10e   : > { %994 = vmatmul.mubr.f32.gmra.mxu0 %v354_v8  ;;  %1925 = vmatpush3.msra.mxu1 %v762_v7  ;;  %v3093_v18 = vpop.permute.xlu0 %481  ;;  %v720_v7 = vld [vmem:[%s2861_s11 + $0x200] sm:$0xff] }
 0x10f   : > { %1879 = vmatpush3.msra.mxu0 %v731_v10  ;;  %1926 = vmatprep.subr.mxu1 %v777_v9  ;;  %v770_v10 = vld [vmem:[%s2861_s11 + $0x390] sm:$0xff] }
 0x110   : > { %v386_v16 = vpop.permute.xlu1 %385  ;;  %1880 = vmatprep.subr.mxu0 %v746_v11  ;;  %1927 = vmatpush3.msra.mxu1 %v761_v12  ;;  %v754_v9 = vld [vmem:[%s2861_s11 + $0x310] sm:$0xff]  ;;  %v769_v11 = vld [vmem:[%s2861_s11 + $0x388] sm:$0xff] }
 0x111   : > { %v394_v19 = vmul.f32 %v386_v16, %v3066_v54  ;;  %2335 = vset.pattern.permute.xlu1 %v2608_v22  ;;  %1881 = vmatpush3.msra.mxu0 %v730_v13 }
 0x112   : > { %597 = vperm.xlu1 %2335, %v2876_v2   ;;  %1882 = vmatprep.subr.mxu0 %v745_v15  ;;  %v753_v15 = vld [vmem:[%s2861_s11 + $0x308] sm:$0xff] }
 0x113   : > { %1079 = vmatmul.mubr.f32.gmra.mxu1 %v394_v19  ;;  %1883 = vmatpush3.msra.mxu0 %v729_v17  ;;  %v3112_v38 = vpop.permute.xlu0 %425  ;;  %v768_v17 = vld [vmem:[%s2861_s11 + $0x380] sm:$0xff] }
 0x114   : > { %1884 = vmatprep.subr.mxu0 %v744_v20  ;;  %1928 = vmatprep.subr.mxu1 %v776_v26  ;;  %v752_v19 = vld [vmem:[%s2861_s11 + $0x300] sm:$0xff]  ;;  %v815_v20 = vld [vmem:[%s2861_s11 + $0x4f8] sm:$0xff]  ;;  %v493_v26 = vmul.f32 %v3093_v18, %v3054_v44 }
 0x115   : > { %v370_v32 = vpop.permute.xlu1 %369  ;;  %1885 = vmatpush3.msra.mxu0 %v728_v27  ;;  %1929 = vmatpush3.msra.mxu1 %v760_v28  ;;  %v799_v27 = vld [vmem:[%s2861_s11 + $0x478] sm:$0xff] }
 0x116   : > { %v375_v35 = vmul.f32 %v370_v32, %v3103_v29  ;;  %2337 = vset.pattern.permute.xlu1 %v2610_v24  ;;  %1886 = vmatprep.subr.mxu0 %v743_v30  ;;  %v847_v18 = vld [vmem:[%s2861_s11 + $0x5f8] sm:$0xff]  ;;  %v798_v32 = vld [vmem:[%s2861_s11 + $0x470] sm:$0xff] }
 0x117   : > { %637 = vperm.xlu1 %2337, %v2876_v2   ;;  %1887 = vmatpush3.msra.mxu0 %v727_v31  ;;  %v814_v31 = vld [vmem:[%s2861_s11 + $0x4f0] sm:$0xff] }
 0x118   : > { %998 = vmatprep.mubr.f32.mxu0 %v375_v35  ;;  %1888 = vmatprep.subr.mxu0 %v742_v34  ;;  %v438_v51 = vpop.permute.xlu0 %437  ;;  %v831_v34 = vld [vmem:[%s2861_s11 + $0x578] sm:$0xff]  ;;  %v813_v35 = vld [vmem:[%s2861_s11 + $0x4e8] sm:$0xff] }
 0x119   : > { %1889 = vmatpush3.msra.mxu0 %v726_v36  ;;  %1930 = vmatprep.subr.mxu1 %v775_v37  ;;  %v452_v4 = vmul.f32 %v438_v51, %v3035_v25  ;;  %v846_v36 = vld [vmem:[%s2861_s11 + $0x5f0] sm:$0xff]  ;;  %v797_v37 = vld [vmem:[%s2861_s11 + $0x468] sm:$0xff]  ;;  %v844_v51 = vld [vmem:[%s2861_s11 + $0x5e0] sm:$0xff] }
 0x11a   : > { %v410_v43 = vpop.permute.xlu1 %409  ;;  %1890 = vmatprep.subr.mxu0 %v741_v39  ;;  %1931 = vmatpush3.msra.mxu1 %v759_v40  ;;  %v812_v40 = vld [vmem:[%s2861_s11 + $0x4e0] sm:$0xff] }
 0x11b   : > { %v415_v47 = vmul.f32 %v410_v43, %v3103_v29  ;;  %2338 = vset.pattern.permute.xlu1 %v2609_v23  ;;  %1891 = vmatpush3.msra.mxu0 %v725_v41  ;;  %v830_v41 = vld [vmem:[%s2861_s11 + $0x570] sm:$0xff]  ;;  %v845_v43 = vld [vmem:[%s2861_s11 + $0x5e8] sm:$0xff] }
 0x11c   : > { %617 = vperm.xlu1 %2338, %v2876_v2   ;;  %1892 = vmatprep.subr.mxu0 %v740_v42  ;;  %v3140_v63 = vpop.permute.xlu0 %449  ;;  %v796_v42 = vld [vmem:[%s2861_s11 + $0x460] sm:$0xff] }
 0x11d   : > { %1083 = vmatprep.mubr.f32.mxu1 %v415_v47  ;;  %1893 = vmatpush3.msra.mxu0 %v724_v45  ;;  %v811_v45 = vld [vmem:[%s2861_s11 + $0x4d8] sm:$0xff] }
 0x11e   : > { %1932 = vmatprep.subr.mxu1 %v774_v48  ;;  %1894 = vmatprep.subr.mxu0 %v739_v49  ;;  %v795_v47 = vld [vmem:[%s2861_s11 + $0x458] sm:$0xff] }
 0x11f   : > { %v390_v55 = vpop.permute.xlu1 %389  ;;  %1933 = vmatpush3.msra.mxu1 %v758_v50  ;;  %999 = vmatmul.mubr.f32.gmra.mxu0 %v355_v46  ;;  %v829_v46 = vld [vmem:[%s2861_s11 + $0x568] sm:$0xff] }
 0x120   : > { %v395_v2 = vmul.f32 %v390_v55, %v3103_v29  ;;  %2340 = vset.pattern.permute.xlu1 %v2607_v21  ;;  %1895 = vmatpush3.msra.mxu0 %v723_v52  ;;  %v794_v52 = vld [vmem:[%s2861_s11 + $0x450] sm:$0xff]  ;;  %v809_v55 = vld [vmem:[%s2861_s11 + $0x4c8] sm:$0xff] }
 0x121   : > { %581 = vperm.xlu1 %2340, %v2884_v6   ;;  %1896 = vmatprep.subr.mxu0 %v738_v53  ;;  %v458_v12 = vpop.permute.xlu0 %457  ;;  %v828_v53 = vld [vmem:[%s2861_s11 + $0x560] sm:$0xff] }
 0x122   : > { %1934 = vmatprep.subr.mxu1 %v773_v56  ;;  %1084 = vmatmul.mubr.f32.gmra.mxu1 %v395_v2  ;;  %v843_v56 = vld [vmem:[%s2861_s11 + $0x5d8] sm:$0xff]  ;;  %v793_v2 = vld [vmem:[%s2861_s11 + $0x448] sm:$0xff] }
 0x123   : > { %1897 = vmatpush3.msra.mxu0 %v722_v57  ;;  %1935 = vmatpush3.msra.mxu1 %v757_v58  ;;  %v434_v57 = vmul.f32 %v3112_v38, %v3066_v54  ;;  %v827_v38 = vld [vmem:[%s2861_s11 + $0x558] sm:$0xff] }
 0x124   : > { %1898 = vmatprep.subr.mxu0 %v737_v59  ;;  %1936 = vmatprep.subr.mxu1 %v772_v60  ;;  %v418_v0 = vpop.permute.xlu1 %417  ;;  %v808_v59 = vld [vmem:[%s2861_s11 + $0x4c0] sm:$0xff] }
 0x125   : > { %1937 = vmatpush3.msra.mxu1 %v756_v61  ;;  %1899 = vmatpush3.msra.mxu0 %v721_v62  ;;  %v432_v8 = vmul.f32 %v418_v0, %v3035_v25  ;;  %v3184_v49 = vpop.permute.xlu0 %469  ;;  %v455_v61 = vmul.f32 %v3140_v63, %v3103_v29  ;;  %v792_v62 = vld [vmem:[%s2861_s11 + $0x440] sm:$0xff]  ;;  %v807_v0 = vld [vmem:[%s2861_s11 + $0x4b8] sm:$0xff]  ;;  %v826_v63 = vld [vmem:[%s2861_s11 + $0x550] sm:$0xff] }
 0x126   : > { %2341 = vset.pattern.permute.xlu1 %v2610_v24  ;;  %1900 = vmatprep.subr.mxu0 %v736_v1  ;;  %v842_v1 = vld [vmem:[%s2861_s11 + $0x5d0] sm:$0xff] }
 0x127   : > { %1938 = vmatprep.subr.mxu1 %v771_v3  ;;  %641 = vperm.xlu1 %2341, %v2884_v6   ;;  %v472_v6 = vmul.f32 %v458_v12, %v3035_v25  ;;  %v805_v12 = vld [vmem:[%s2861_s11 + $0x4a8] sm:$0xff] }
 0x128   : > { %1939 = vmatpush3.msra.mxu1 %v755_v5  ;;  %1901 = vmatpush3.msra.mxu0 %v720_v7  ;;  %v841_v5 = vld [vmem:[%s2861_s11 + $0x5c8] sm:$0xff]  ;;  %v806_v7 = vld [vmem:[%s2861_s11 + $0x4b0] sm:$0xff] }
 0x129   : > { %1153 = vmatprep.mubr.f32.mxu0 %v452_v4  ;;  %1940 = vmatprep.subr.mxu1 %v770_v10  ;;  %v478_v13 = vpop.permute.xlu1 %477  ;;  %v791_v4 = vld [vmem:[%s2861_s11 + $0x438] sm:$0xff]  ;;  %v825_v10 = vld [vmem:[%s2861_s11 + $0x548] sm:$0xff] }
 0x12a   : > { %1154 = vmatmul.mubr.f32.vlgmr.msra.gmra.mxu0 %v432_v8  ;;  %1941 = vmatpush3.msra.mxu1 %v754_v9  ;;  %v492_v16 = vmul.f32 %v478_v13, %v3035_v25  ;;  %v3200_v60 = vpop.permute.xlu0 %501  ;;  %v790_v9 = vld [vmem:[%s2861_s11 + $0x430] sm:$0xff]  ;;  %v789_v13 = vld [vmem:[%s2861_s11 + $0x428] sm:$0xff] }
 0x12b   : > { %1942 = vmatprep.subr.mxu1 %v769_v11  ;;  %2343 = vset.pattern.permute.xlu1 %v2608_v22  ;;  %v840_v11 = vld [vmem:[%s2861_s11 + $0x5c0] sm:$0xff] }
 0x12c   : > { %1943 = vmatpush3.msra.mxu1 %v753_v15  ;;  %605 = vperm.xlu1 %2343, %v2897_v14  }
 0x12d   : > { %1944 = vmatprep.subr.mxu1 %v768_v17  ;;  %1238 = vmatprep.mubr.f32.mxu1 %v492_v16  ;;  %v804_v16 = vld [vmem:[%s2861_s11 + $0x4a0] sm:$0xff]  ;;  %v839_v17 = vld [vmem:[%s2861_s11 + $0x5b8] sm:$0xff] }
 0x12e   : > { %1945 = vmatpush3.msra.mxu1 %v752_v19  ;;  %v442_v28 = vpop.permute.xlu1 %441  ;;  %1958 = vmatprep.subr.mxu0 %v815_v20  ;;  %v823_v19 = vld [vmem:[%s2861_s11 + $0x538] sm:$0xff] }
 0x12f   : > { %1239 = vmatmul.mubr.f32.vlgmr.msra.gmra.mxu1 %v472_v6  ;;  %v453_v30 = vmul.f32 %v442_v28, %v3054_v44  ;;  %1959 = vmatpush3.msra.mxu0 %v799_v27  ;;  %v3216_v8 = vpop.permute.xlu0 %525  ;;  %v788_v6 = vld [vmem:[%s2861_s11 + $0x420] sm:$0xff]  ;;  %v803_v20 = vld [vmem:[%s2861_s11 + $0x498] sm:$0xff]  ;;  %v838_v27 = vld [vmem:[%s2861_s11 + $0x5b0] sm:$0xff] }
 0x130   : > { %2344 = vset.pattern.permute.xlu1 %v2607_v21  ;;  %1243 = vmatprep.mubr.f32.mxu1 %v493_v26  ;;  %v787_v28 = vld [vmem:[%s2861_s11 + $0x418] sm:$0xff] }
 0x131   : > { %585 = vperm.xlu1 %2344, %v2897_v14   ;;  %1158 = vmatprep.mubr.f32.mxu0 %v453_v30 }
 0x132   : > { %1960 = vmatprep.subr.mxu0 %v814_v31  ;;  %2002 = vmatprep.subr.mxu1 %v847_v18  ;;  %v822_v31 = vld [vmem:[%s2861_s11 + $0x530] sm:$0xff] }
 0x133   : > { %v422_v39 = vpop.permute.xlu1 %421  ;;  %1961 = vmatpush3.msra.mxu0 %v798_v32  ;;  %2003 = vmatpush3.msra.mxu1 %v831_v34  ;;  %v837_v32 = vld [vmem:[%s2861_s11 + $0x5a8] sm:$0xff]  ;;  %v802_v34 = vld [vmem:[%s2861_s11 + $0x490] sm:$0xff] }
 0x134   : > { %v433_v21 = vmul.f32 %v422_v39, %v3054_v44  ;;  %1962 = vmatprep.subr.mxu0 %v813_v35  ;;  %2004 = vmatprep.subr.mxu1 %v846_v36  ;;  %v3231_v26 = vpop.permute.xlu0 %545  ;;  %v821_v35 = vld [vmem:[%s2861_s11 + $0x528] sm:$0xff]  ;;  %v786_v36 = vld [vmem:[%s2861_s11 + $0x410] sm:$0xff] }
 0x135   : > { %2346 = vset.pattern.permute.xlu1 %v2609_v23  ;;  %1963 = vmatpush3.msra.mxu0 %v797_v37  ;;  %v836_v37 = vld [vmem:[%s2861_s11 + $0x5a0] sm:$0xff]  ;;  %v801_v39 = vld [vmem:[%s2861_s11 + $0x488] sm:$0xff] }
 0x136   : > { %625 = vperm.xlu1 %2346, %v2897_v14   ;;  %1159 = vmatmul.mubr.f32.gmra.mxu0 %v433_v21  ;;  %v810_v14 = vld [vmem:[%s2861_s11 + $0x4d0] sm:$0xff]  ;;  %v820_v21 = vld [vmem:[%s2861_s11 + $0x520] sm:$0xff] }
 0x137   : > { %1964 = vmatprep.subr.mxu0 %v812_v40  ;;  %2005 = vmatpush3.msra.mxu1 %v830_v41  ;;  %v785_v40 = vld [vmem:[%s2861_s11 + $0x408] sm:$0xff] }
 0x138   : > { %v462_v48 = vpop.permute.xlu1 %461  ;;  %1965 = vmatpush3.msra.mxu0 %v796_v42  ;;  %2006 = vmatprep.subr.mxu1 %v845_v43  ;;  %v475_v42 = vmul.f32 %v3184_v49, %v3103_v29 }
 0x139   : > { %v473_v50 = vmul.f32 %v462_v48, %v3054_v44  ;;  %1966 = vmatprep.subr.mxu0 %v811_v45  ;;  %2007 = vmatpush3.msra.mxu1 %v829_v46  ;;  %v558_v41 = vpop.permute.xlu0 %557  ;;  %v835_v45 = vld [vmem:[%s2861_s11 + $0x598] sm:$0xff] }
 0x13a   : > { %2347 = vset.pattern.permute.xlu1 %v2608_v22  ;;  %1967 = vmatpush3.msra.mxu0 %v795_v47  ;;  %v800_v47 = vld [vmem:[%s2861_s11 + $0x480] sm:$0xff]  ;;  %v819_v48 = vld [vmem:[%s2861_s11 + $0x518] sm:$0xff]  ;;  %v572_v49 = vmul.f32 %v558_v41, %v3035_v25 }
 0x13b   : > { %609 = vperm.xlu1 %2347, %v2927_v33   ;;  %1244 = vmatmul.mubr.f32.gmra.mxu1 %v473_v50  ;;  %v784_v50 = vld [vmem:[%s2861_s11 + $0x400] sm:$0xff] }
 0x13c   : > { %1968 = vmatprep.subr.mxu0 %v810_v14  ;;  %2008 = vmatprep.subr.mxu1 %v844_v51  ;;  %v834_v14 = vld [vmem:[%s2861_s11 + $0x590] sm:$0xff] }
 0x13d   : > { %v446_v58 = vpop.permute.xlu1 %445  ;;  %1969 = vmatpush3.msra.mxu0 %v794_v52  ;;  %2009 = vmatpush3.msra.mxu1 %v828_v53  ;;  %v818_v51 = vld [vmem:[%s2861_s11 + $0x510] sm:$0xff]  ;;  %v879_v52 = vld [vmem:[%s2861_s11 + $0x6f8] sm:$0xff] }
 0x13e   : > { %v454_v22 = vmul.f32 %v446_v58, %v3066_v54  ;;  %1970 = vmatprep.subr.mxu0 %v809_v55  ;;  %2010 = vmatprep.subr.mxu1 %v843_v56  ;;  %v833_v55 = vld [vmem:[%s2861_s11 + $0x588] sm:$0xff]  ;;  %v816_v58 = vld [vmem:[%s2861_s11 + $0x500] sm:$0xff] }
 0x13f   : > { %2349 = vset.pattern.permute.xlu1 %v2610_v24  ;;  %1971 = vmatpush3.msra.mxu0 %v793_v2  ;;  %v817_v2 = vld [vmem:[%s2861_s11 + $0x508] sm:$0xff] }
 0x140   : > { %649 = vperm.xlu1 %2349, %v2927_v33   ;;  %1163 = vmatprep.mubr.f32.mxu0 %v454_v22  ;;  %v911_v22 = vld [vmem:[%s2861_s11 + $0x7f8] sm:$0xff] }
 0x141   : > { %1164 = vmatmul.mubr.f32.gmra.mxu0 %v434_v57  ;;  %1972 = vmatprep.subr.mxu0 %v808_v59  ;;  %v832_v57 = vld [vmem:[%s2861_s11 + $0x580] sm:$0xff] }
 0x142   : > { %v486_v3 = vpop.permute.xlu1 %485  ;;  %2011 = vmatpush3.msra.mxu1 %v827_v38  ;;  %1973 = vmatpush3.msra.mxu0 %v792_v62  ;;  %v863_v38 = vld [vmem:[%s2861_s11 + $0x678] sm:$0xff]  ;;  %v878_v62 = vld [vmem:[%s2861_s11 + $0x6f0] sm:$0xff] }
 0x143   : > { %v494_v24 = vmul.f32 %v486_v3, %v3066_v54  ;;  %2012 = vmatprep.subr.mxu1 %v842_v1  ;;  %1168 = vmatprep.mubr.f32.mxu0 %v455_v61  ;;  %v862_v1 = vld [vmem:[%s2861_s11 + $0x670] sm:$0xff] }
 0x144   : > { %2350 = vset.pattern.permute.xlu1 %v2609_v23  ;;  %1974 = vmatprep.subr.mxu0 %v807_v0  ;;  %v877_v0 = vld [vmem:[%s2861_s11 + $0x6e8] sm:$0xff] }
 0x145   : > { %629 = vperm.xlu1 %2350, %v2927_v33   ;;  %1248 = vmatprep.mubr.f32.mxu1 %v494_v24  ;;  %v824_v33 = vld [vmem:[%s2861_s11 + $0x540] sm:$0xff]  ;;  %v861_v24 = vld [vmem:[%s2861_s11 + $0x668] sm:$0xff] }
 0x146   : > { %2013 = vmatpush3.msra.mxu1 %v826_v63  ;;  %1975 = vmatpush3.msra.mxu0 %v791_v4  ;;  %v876_v4 = vld [vmem:[%s2861_s11 + $0x6e0] sm:$0xff] }
 0x147   : > { %v466_v23 = vpop.permute.xlu1 %465  ;;  %2014 = vmatprep.subr.mxu1 %v841_v5  ;;  %1976 = vmatprep.subr.mxu0 %v806_v7  ;;  %v895_v5 = vld [vmem:[%s2861_s11 + $0x778] sm:$0xff]  ;;  %v860_v7 = vld [vmem:[%s2861_s11 + $0x660] sm:$0xff] }
 0x148   : > { %v474_v15 = vmul.f32 %v466_v23, %v3066_v54  ;;  %2015 = vmatpush3.msra.mxu1 %v825_v10  ;;  %1977 = vmatpush3.msra.mxu0 %v790_v9  ;;  %v910_v10 = vld [vmem:[%s2861_s11 + $0x7f0] sm:$0xff]  ;;  %v875_v9 = vld [vmem:[%s2861_s11 + $0x6d8] sm:$0xff]  ;;  %v909_v23 = vld [vmem:[%s2861_s11 + $0x7e8] sm:$0xff] }
 0x149   : > { %2016 = vmatprep.subr.mxu1 %v840_v11  ;;  %1978 = vmatprep.subr.mxu0 %v805_v12  ;;  %v894_v11 = vld [vmem:[%s2861_s11 + $0x770] sm:$0xff]  ;;  %v859_v12 = vld [vmem:[%s2861_s11 + $0x658] sm:$0xff] }
 0x14a   : > { %1249 = vmatmul.mubr.f32.gmra.mxu1 %v474_v15  ;;  %1979 = vmatpush3.msra.mxu0 %v789_v13  ;;  %v874_v15 = vld [vmem:[%s2861_s11 + $0x6d0] sm:$0xff] }
 0x14b   : > { %2017 = vmatpush3.msra.mxu1 %v824_v33  ;;  %1980 = vmatprep.subr.mxu0 %v804_v16  ;;  %v534_v33 = vmul.f32 %v3216_v8, %v3066_v54  ;;  %v892_v8 = vld [vmem:[%s2861_s11 + $0x760] sm:$0xff] }
 0x14c   : > { %v430_v30 = vpop.permute.xlu1 %429  ;;  %2018 = vmatprep.subr.mxu1 %v839_v17  ;;  %1981 = vmatpush3.msra.mxu0 %v788_v6  ;;  %v893_v17 = vld [vmem:[%s2861_s11 + $0x768] sm:$0xff]  ;;  %v858_v6 = vld [vmem:[%s2861_s11 + $0x650] sm:$0xff] }
 0x14d   : > { %v435_v18 = vmul.f32 %v430_v30, %v3103_v29  ;;  %2019 = vmatpush3.msra.mxu1 %v823_v19  ;;  %1982 = vmatprep.subr.mxu0 %v803_v20  ;;  %v908_v19 = vld [vmem:[%s2861_s11 + $0x7e0] sm:$0xff]  ;;  %v857_v20 = vld [vmem:[%s2861_s11 + $0x648] sm:$0xff] }
 0x14e   : > { %2020 = vmatprep.subr.mxu1 %v838_v27  ;;  %1983 = vmatpush3.msra.mxu0 %v787_v28  ;;  %v872_v28 = vld [vmem:[%s2861_s11 + $0x6c0] sm:$0xff] }
 0x14f   : > { %1169 = vmatmul.mubr.f32.gmra.mxu0 %v435_v18  ;;  %2021 = vmatpush3.msra.mxu1 %v822_v31  ;;  %v856_v31 = vld [vmem:[%s2861_s11 + $0x640] sm:$0xff]  ;;  %v907_v18 = vld [vmem:[%s2861_s11 + $0x7d8] sm:$0xff] }
 0x150   : > { %2022 = vmatprep.subr.mxu1 %v837_v32  ;;  %1984 = vmatprep.subr.mxu0 %v802_v34  ;;  %v871_v32 = vld [vmem:[%s2861_s11 + $0x6b8] sm:$0xff] }
 0x151   : > { %v490_v43 = vpop.permute.xlu1 %489  ;;  %2023 = vmatpush3.msra.mxu1 %v821_v35  ;;  %1985 = vmatpush3.msra.mxu0 %v786_v36  ;;  %v891_v34 = vld [vmem:[%s2861_s11 + $0x758] sm:$0xff]  ;;  %v906_v36 = vld [vmem:[%s2861_s11 + $0x7d0] sm:$0xff] }
 0x152   : > { %v495_v46 = vmul.f32 %v490_v43, %v3103_v29  ;;  %2024 = vmatprep.subr.mxu1 %v836_v37  ;;  %1986 = vmatprep.subr.mxu0 %v801_v39  ;;  %v855_v35 = vld [vmem:[%s2861_s11 + $0x638] sm:$0xff]  ;;  %v870_v37 = vld [vmem:[%s2861_s11 + $0x6b0] sm:$0xff]  ;;  %v905_v43 = vld [vmem:[%s2861_s11 + $0x7c8] sm:$0xff] }
 0x153   : > { %2025 = vmatpush3.msra.mxu1 %v820_v21  ;;  %1987 = vmatpush3.msra.mxu0 %v785_v40  ;;  %v890_v39 = vld [vmem:[%s2861_s11 + $0x750] sm:$0xff] }
 0x154   : > { %1253 = vmatprep.mubr.f32.mxu1 %v495_v46  ;;  %2026 = vmatprep.subr.mxu1 %v835_v45  ;;  %v854_v40 = vld [vmem:[%s2861_s11 + $0x630] sm:$0xff]  ;;  %v853_v45 = vld [vmem:[%s2861_s11 + $0x628] sm:$0xff] }
 0x155   : > { %1254 = vmatmul.mubr.f32.gmra.mxu1 %v475_v42  ;;  %1988 = vmatprep.subr.mxu0 %v800_v47  ;;  %v869_v42 = vld [vmem:[%s2861_s11 + $0x6a8] sm:$0xff]  ;;  %v868_v47 = vld [vmem:[%s2861_s11 + $0x6a0] sm:$0xff] }
 0x156   : > { %v518_v53 = vpop.permute.xlu1 %517  ;;  %2027 = vmatpush3.msra.mxu1 %v819_v48  ;;  %1989 = vmatpush3.msra.mxu0 %v784_v50  ;;  %v889_v46 = vld [vmem:[%s2861_s11 + $0x748] sm:$0xff]  ;;  %v904_v48 = vld [vmem:[%s2861_s11 + $0x7c0] sm:$0xff] }
 0x157   : > { %v532_v56 = vmul.f32 %v518_v53, %v3035_v25  ;;  %2028 = vmatprep.subr.mxu1 %v834_v14  ;;  %1408 = vmatprep.mubr.f32.mxu1 %v572_v49  ;;  %v888_v50 = vld [vmem:[%s2861_s11 + $0x740] sm:$0xff]  ;;  %v867_v14 = vld [vmem:[%s2861_s11 + $0x698] sm:$0xff] }
 0x158   : > { %2029 = vmatpush3.msra.mxu1 %v818_v51  ;;  %2046 = vmatprep.subr.mxu0 %v879_v52  ;;  %v851_v52 = vld [vmem:[%s2861_s11 + $0x618] sm:$0xff] }
 0x159   : > { %1323 = vmatprep.mubr.f32.mxu0 %v532_v56  ;;  %2030 = vmatprep.subr.mxu1 %v833_v55  ;;  %v903_v53 = vld [vmem:[%s2861_s11 + $0x7b8] sm:$0xff]  ;;  %v866_v55 = vld [vmem:[%s2861_s11 + $0x690] sm:$0xff] }
 0x15a   : > { %2031 = vmatpush3.msra.mxu1 %v817_v2  ;;  %v887_v56 = vld [vmem:[%s2861_s11 + $0x738] sm:$0xff]  ;;  %v570_v2 = vpop.permute.xlu0 %569 }
 0x15b   : > { %v498_v59 = vpop.permute.xlu1 %497  ;;  %2032 = vmatprep.subr.mxu1 %v832_v57  ;;  %v850_v57 = vld [vmem:[%s2861_s11 + $0x610] sm:$0xff] }
 0x15c   : > { %v512_v61 = vmul.f32 %v498_v59, %v3035_v25  ;;  %2033 = vmatpush3.msra.mxu1 %v816_v58  ;;  %v902_v58 = vld [vmem:[%s2861_s11 + $0x7b0] sm:$0xff] }
 0x15d   : > { %2090 = vmatprep.subr.mxu1 %v911_v22  ;;  %v865_v22 = vld [vmem:[%s2861_s11 + $0x688] sm:$0xff]  ;;  %v886_v59 = vld [vmem:[%s2861_s11 + $0x730] sm:$0xff] }
 0x15e   : > { %1324 = vmatmul.mubr.f32.vlgmr.msra.gmra.mxu0 %v512_v61  ;;  %v554_v61 = vmul.f32 %v3231_v26, %v3066_v54  ;;  %v885_v26 = vld [vmem:[%s2861_s11 + $0x728] sm:$0xff] }
 0x15f   : > { %2047 = vmatpush3.msra.mxu0 %v863_v38 }
 0x160   : > { %v538_v3 = vpop.permute.xlu1 %537  ;;  %2048 = vmatprep.subr.mxu0 %v878_v62  ;;  %v849_v62 = vld [vmem:[%s2861_s11 + $0x608] sm:$0xff] }
 0x161   : > { %v552_v63 = vmul.f32 %v538_v3, %v3035_v25  ;;  %2049 = vmatpush3.msra.mxu0 %v862_v1  ;;  %v513_v25 = vmul.f32 %v3200_v60, %v3054_v44  ;;  %v873_v60 = vld [vmem:[%s2861_s11 + $0x6c8] sm:$0xff] }
 0x162   : > { %2050 = vmatprep.subr.mxu0 %v877_v0  ;;  %v575_v0 = vmul.f32 %v570_v2, %v3103_v29  ;;  %v901_v3 = vld [vmem:[%s2861_s11 + $0x7a8] sm:$0xff] }
 0x163   : > { %1409 = vmatmul.mubr.f32.vlgmr.msra.gmra.mxu1 %v552_v63  ;;  %2051 = vmatpush3.msra.mxu0 %v861_v24  ;;  %v864_v24 = vld [vmem:[%s2861_s11 + $0x680] sm:$0xff] }
 0x164   : > { %2052 = vmatprep.subr.mxu0 %v876_v4  ;;  %2091 = vmatpush3.msra.mxu1 %v895_v5  ;;  %v848_v63 = vld [vmem:[%s2861_s11 + $0x600] sm:$0xff] }
 0x165   : > { %v522_v13 = vpop.permute.xlu1 %521  ;;  %2053 = vmatpush3.msra.mxu0 %v860_v7  ;;  %2092 = vmatprep.subr.mxu1 %v910_v10  ;;  %v884_v5 = vld [vmem:[%s2861_s11 + $0x720] sm:$0xff]  ;;  %v899_v10 = vld [vmem:[%s2861_s11 + $0x798] sm:$0xff] }
 0x166   : > { %v533_v16 = vmul.f32 %v522_v13, %v3054_v44  ;;  %2054 = vmatprep.subr.mxu0 %v875_v9  ;;  %2093 = vmatpush3.msra.mxu1 %v894_v11  ;;  %v883_v9 = vld [vmem:[%s2861_s11 + $0x718] sm:$0xff]  ;;  %v898_v11 = vld [vmem:[%s2861_s11 + $0x790] sm:$0xff] }
 0x167   : > { %2055 = vmatpush3.msra.mxu0 %v859_v12  ;;  %2094 = vmatprep.subr.mxu1 %v909_v23  ;;  %v882_v12 = vld [vmem:[%s2861_s11 + $0x710] sm:$0xff] }
 0x168   : > { %1328 = vmatprep.mubr.f32.mxu0 %v533_v16  ;;  %2056 = vmatprep.subr.mxu0 %v874_v15  ;;  %v881_v15 = vld [vmem:[%s2861_s11 + $0x708] sm:$0xff]  ;;  %v880_v16 = vld [vmem:[%s2861_s11 + $0x700] sm:$0xff] }
 0x169   : > { %1329 = vmatmul.mubr.f32.gmra.mxu0 %v513_v25  ;;  %2095 = vmatpush3.msra.mxu1 %v893_v17  ;;  %v897_v25 = vld [vmem:[%s2861_s11 + $0x788] sm:$0xff]  ;;  %v578_v17 = vpop.permute.xlu0 %577 }
 0x16a   : > { %v562_v27 = vpop.permute.xlu1 %561  ;;  %1333 = vmatprep.mubr.f32.mxu0 %v534_v33  ;;  %2057 = vmatpush3.msra.mxu0 %v858_v6  ;;  %v896_v33 = vld [vmem:[%s2861_s11 + $0x780] sm:$0xff] }
 0x16b   : > { %v573_v30 = vmul.f32 %v562_v27, %v3054_v44  ;;  %2058 = vmatprep.subr.mxu0 %v873_v60  ;;  %2096 = vmatprep.subr.mxu1 %v908_v19 }
 0x16c   : > { %2059 = vmatpush3.msra.mxu0 %v857_v20  ;;  %2097 = vmatpush3.msra.mxu1 %v892_v8  ;;  %v2352_v8 = vld [vmem:[%s2851_s4] sm:$0xff] }
 0x16d   : > { %1413 = vmatprep.mubr.f32.mxu1 %v573_v30  ;;  %2060 = vmatprep.subr.mxu0 %v872_v28  ;;  %v602_v19 = vpop.permute.xlu0 %601  ;;  %v592_v27 = vmul.f32 %v2352_v8, %v578_v17  ;;  %v2353_v30 = vld [vmem:[%s2851_s4 + $0x8] sm:$0xff] }
 0x16e   : > { %2061 = vmatpush3.msra.mxu0 %v856_v31  ;;  %2098 = vmatprep.subr.mxu1 %v907_v18  ;;  %v613_v31 = vmul.f32 %v2353_v30, %v602_v19 }
 0x16f   : > { %v542_v21 = vpop.permute.xlu1 %541  ;;  %2062 = vmatprep.subr.mxu0 %v871_v32  ;;  %2099 = vmatpush3.msra.mxu1 %v891_v34 }
 0x170   : > { %v553_v41 = vmul.f32 %v542_v21, %v3054_v44  ;;  %2063 = vmatpush3.msra.mxu0 %v855_v35  ;;  %2100 = vmatprep.subr.mxu1 %v906_v36  ;;  %v852_v44 = vld [vmem:[%s2861_s11 + $0x620] sm:$0xff] }
 0x171   : > { %2064 = vmatprep.subr.mxu0 %v870_v37  ;;  %2101 = vmatpush3.msra.mxu1 %v890_v39  ;;  %v622_v37 = vpop.permute.xlu0 %621 }
 0x172   : > { %1414 = vmatmul.mubr.f32.gmra.mxu1 %v553_v41  ;;  %2065 = vmatpush3.msra.mxu0 %v854_v40  ;;  %v633_v41 = vmul.f32 %v2353_v30, %v622_v37 }
 0x173   : > { %2066 = vmatprep.subr.mxu0 %v869_v42  ;;  %2102 = vmatprep.subr.mxu1 %v905_v43  ;;  %v2354_v43 = vld [vmem:[%s2851_s4 + $0x10] sm:$0xff] }
 0x174   : > { %v506_v49 = vpop.permute.xlu1 %505  ;;  %2067 = vmatpush3.msra.mxu0 %v853_v45  ;;  %2103 = vmatpush3.msra.mxu1 %v889_v46 }
 0x175   : > { %v514_v51 = vmul.f32 %v506_v49, %v3066_v54  ;;  %2068 = vmatprep.subr.mxu0 %v868_v47  ;;  %2104 = vmatprep.subr.mxu1 %v904_v48  ;;  %v646_v21 = vpop.permute.xlu0 %645 }
 0x176   : > { %2069 = vmatpush3.msra.mxu0 %v852_v44  ;;  %2105 = vmatpush3.msra.mxu1 %v888_v50  ;;  %v654_v45 = vmul.f32 %v2354_v43, %v646_v21 }
 0x177   : > { %1334 = vmatmul.mubr.f32.gmra.mxu0 %v514_v51  ;;  %2070 = vmatprep.subr.mxu0 %v867_v14 }
 0x178   : > { %2071 = vmatpush3.msra.mxu0 %v851_v52  ;;  %2106 = vmatprep.subr.mxu1 %v903_v53 }
 0x179   : > { %v566_v38 = vpop.permute.xlu1 %565  ;;  %2072 = vmatprep.subr.mxu0 %v866_v55  ;;  %2107 = vmatpush3.msra.mxu1 %v887_v56  ;;  %v590_v14 = vpop.permute.xlu0 %589 }
 0x17a   : > { %v574_v1 = vmul.f32 %v566_v38, %v3066_v54  ;;  %2073 = vmatpush3.msra.mxu0 %v850_v57  ;;  %2108 = vmatprep.subr.mxu1 %v902_v58  ;;  %v900_v54 = vld [vmem:[%s2861_s11 + $0x7a0] sm:$0xff]  ;;  %v595_v52 = vmul.f32 %v590_v14, %v3103_v29  ;;  %s3428_s11 = scalar_lea.sflag [#allocation4], %s313_s0 }
 0x17b   : > { %2074 = vmatprep.subr.mxu0 %v865_v22  ;;  %2109 = vmatpush3.msra.mxu1 %v886_v59 }
 0x17c   : > { %1418 = vmatprep.mubr.f32.mxu1 %v574_v1  ;;  %2075 = vmatpush3.msra.mxu0 %v849_v62 }
 0x17d   : > { %1419 = vmatmul.mubr.f32.gmra.mxu1 %v554_v61  ;;  %2110 = vmatprep.subr.mxu1 %v901_v3 }
 0x17e   : > { %v530_v4 = vpop.permute.xlu1 %529  ;;  %1423 = vmatprep.mubr.f32.mxu1 %v575_v0  ;;  %2076 = vmatprep.subr.mxu0 %v864_v24 }
 0x17f   : > { %v535_v7 = vmul.f32 %v530_v4, %v3103_v29  ;;  %2111 = vmatpush3.msra.mxu1 %v885_v26  ;;  %2077 = vmatpush3.msra.mxu0 %v848_v63 }
 0x180   : > { %2112 = vmatprep.subr.mxu1 %v900_v54 }
 0x181   : > { %1338 = vmatprep.mubr.f32.mxu0 %v535_v7  ;;  %2113 = vmatpush3.msra.mxu1 %v884_v5  ;;  %v3360_v7 = vld [vmem:[%s277_s25] ss:$0 sm:$0xff] }
 0x182   : > { %2114 = vmatprep.subr.mxu1 %v899_v10 }
 0x183   : > { %v510_v23 = vpop.permute.xlu1 %509  ;;  %2115 = vmatpush3.msra.mxu1 %v883_v9 }
 0x184   : > { %v515_v13 = vmul.f32 %v510_v23, %v3103_v29  ;;  %2116 = vmatprep.subr.mxu1 %v898_v11 }
 0x185   : > { %2117 = vmatpush3.msra.mxu1 %v882_v12 }
 0x186   : > { %1339 = vmatmul.mubr.f32.gmra.mxu0 %v515_v13  ;;  %2118 = vmatprep.subr.mxu1 %v897_v25 }
 0x187   : > { %2119 = vmatpush3.msra.mxu1 %v881_v15 }
 0x188   : > { %v550_v6 = vpop.permute.xlu1 %549  ;;  %2120 = vmatprep.subr.mxu1 %v896_v33 }
 0x189   : > { %v555_v60 = vmul.f32 %v550_v6, %v3103_v29  ;;  %2121 = vmatpush3.msra.mxu1 %v880_v16 }
 0x18b   : > { %1424 = vmatmul.mubr.f32.gmra.mxu1 %v555_v60 }
 0x18d   : > { %v598_v20 = vpop.permute.xlu1 %597 }
 0x18e   : > { %v612_v28 = vmul.f32 %v2352_v8, %v598_v20 }
 0x190   : > { %1493 = vmatprep.mubr.f32.mxu0 %v612_v28 }
 0x191   : > { %1494 = vmatmul.mubr.f32.vlgmr.msra.gmra.mxu0 %v592_v27 }
 0x192   : > { %v638_v18 = vpop.permute.xlu1 %637  ;;  %1498 = vmatprep.mubr.f32.mxu0 %v613_v31 }
 0x193   : > { %v652_v32 = vmul.f32 %v2352_v8, %v638_v18 }
 0x195   : > { %1578 = vmatprep.mubr.f32.mxu1 %v652_v32 }
 0x197   : > { %v618_v34 = vpop.permute.xlu1 %617 }
 0x198   : > { %v632_v35 = vmul.f32 %v2352_v8, %v618_v34 }
 0x19a   : > { %1579 = vmatmul.mubr.f32.vlgmr.msra.gmra.mxu1 %v632_v35 }
 0x19c   : > { %v582_v36 = vpop.permute.xlu1 %581 }
 0x19d   : > { %v593_v39 = vmul.f32 %v2353_v30, %v582_v36 }
 0x19f   : > { %1499 = vmatmul.mubr.f32.gmra.mxu0 %v593_v39 }
 0x1a2   : > { %v642_v40 = vpop.permute.xlu1 %641 }
 0x1a3   : > { %v653_v42 = vmul.f32 %v2353_v30, %v642_v40 }
 0x1a5   : > { %1583 = vmatprep.mubr.f32.mxu1 %v653_v42 }
 0x1a6   : > { %1584 = vmatmul.mubr.f32.gmra.mxu1 %v633_v41 }
 0x1a7   : > { %v606_v46 = vpop.permute.xlu1 %605  ;;  %1588 = vmatprep.mubr.f32.mxu1 %v654_v45 }
 0x1a8   : > { %v614_v47 = vmul.f32 %v2354_v43, %v606_v46 }
 0x1aa   : > { %1503 = vmatprep.mubr.f32.mxu0 %v614_v47 }
 0x1ac   : > { %v586_v48 = vpop.permute.xlu1 %585 }
 0x1ad   : > { %v594_v44 = vmul.f32 %v2354_v43, %v586_v48 }
 0x1af   : > { %1504 = vmatmul.mubr.f32.gmra.mxu0 %v594_v44 }
 0x1b1   : > { %v626_v50 = vpop.permute.xlu1 %625 }
 0x1b2   : > { %v634_v49 = vmul.f32 %v2354_v43, %v626_v50 }
 0x1b4   : > { %1589 = vmatmul.mubr.f32.gmra.mxu1 %v634_v49 }
 0x1b6   : > { %v610_v51 = vpop.permute.xlu1 %609 }
 0x1b7   : > { %v615_v53 = vmul.f32 %v610_v51, %v3103_v29 }
 0x1b9   : > { %1508 = vmatprep.mubr.f32.mxu0 %v615_v53 }
 0x1ba   : > { %1509 = vmatmul.mubr.f32.gmra.mxu0 %v595_v52  ;;  %v1858_v22 = vpop.f32.mrf.mxu1 }
 0x1bb   : > { %v650_v55 = vpop.permute.xlu1 %649 }
 0x1bc   : > { %v655_v56 = vmul.f32 %v650_v55, %v3103_v29  ;;  %v1859_v38 = vpop.f32.mrf.mxu1 }
 0x1bd   : > { %v1860_v48 = vadd.f32 %v1859_v38, %v1858_v22 }
 0x1be   : > { %1593 = vmatprep.mubr.f32.mxu1 %v655_v56 }
 0x1c0   : > { %v630_v2 = vpop.permute.xlu1 %629 }
 0x1c1   : > { %v635_v57 = vmul.f32 %v630_v2, %v3103_v29 }
 0x1c3   : > { %1594 = vmatmul.mubr.f32.gmra.mxu1 %v635_v57 }
 0x1c4   : > { %v1814_v58 = vpop.f32.mrf.mxu0 }
 0x1c6   : > { %v1815_v59 = vpop.f32.mrf.mxu0  ;;  %v3348_v62 = vpop.f32.mrf.mxu1 }
 0x1c7   : > { %v1816_v41 = vadd.f32 %v1815_v59, %v1814_v58 }
 0x1c8   : > { %v1817_v61 = vpop.f32.mrf.mxu0  ;;  %v1862_v0 = vpop.f32.mrf.mxu1 }
 0x1c9   : > { %v986_v46 = vadd.f32 %v1816_v41, %v3360_v7  ;;  %v1863_v22 = vadd.f32 %v1862_v0, %v3348_v62 }
 0x1ca   : > { %v1818_v1 = vpop.f32.mrf.mxu0 }
 0x1cb   : > { %v1071_v14 = vadd.f32 %v1860_v48, %v986_v46  ;;  %v1819_v53 = vadd.f32 %v1818_v1, %v1817_v61 }
 0x1ce   : > { %v3350_v3 = vpop.f32.mrf.mxu0 }
 0x1d0   : > { %v3354_v26 = vpop.f32.mrf.mxu0 }
 0x1d3   : > { %v3352_v24 = vpop.f32.mrf.mxu1 }
 0x1d5   : > { %v3356_v54 = vpop.f32.mrf.mxu1 }
 0x1df   : > { %v1823_v63 = vpop.f32.mrf.mxu0 }
 0x1e1   : > { %v1824_v29 = vpop.f32.mrf.mxu0 }
 0x1e2   : > { %v1825_v4 = vadd.f32 %v1824_v29, %v1823_v63  ;;  %v1867_v5 = vpop.f32.mrf.mxu1  ;;  %v991_v63 = vadd.f32 %v1819_v53, %v3360_v7 }
 0x1e4   : > { %v1001_v10 = vadd.f32 %v1825_v4, %v3360_v7  ;;  %v1868_v9 = vpop.f32.mrf.mxu1 }
 0x1e5   : > { %v1869_v11 = vadd.f32 %v1868_v9, %v1867_v5  ;;  %v1076_v9 = vadd.f32 %v1863_v22, %v991_v63 }
 0x1e7   : > { %v3363_v12 = vadd.f32 %v1869_v11, %v1001_v10 }
 0x1ea   : > { %v1902_v23 = vpop.f32.mrf.mxu0 }
 0x1ec   : > { %v1903_v25 = vpop.f32.mrf.mxu0 }
 0x1ed   : > { %v1904_v44 = vadd.f32 %v1903_v25, %v1902_v23 }
 0x1ef   : > { %v1946_v15 = vpop.f32.mrf.mxu1  ;;  %v1156_v55 = vadd.f32 %v1904_v44, %v1071_v14 }
 0x1f1   : > { %v1947_v16 = vpop.f32.mrf.mxu1 }
 0x1f2   : > { %v1948_v51 = vadd.f32 %v1947_v16, %v1946_v15 }
 0x1f4   : > { %v1241_v57 = vadd.f32 %v1948_v51, %v1156_v55 }
 0x1f6   : > { %v1905_v13 = vpop.f32.mrf.mxu0 }
 0x1f8   : > { %v1906_v33 = vpop.f32.mrf.mxu0 }
 0x1f9   : > { %v1907_v61 = vadd.f32 %v1906_v33, %v1905_v13  ;;  %v1822_v13 = vadd.f32 %v3354_v26, %v3350_v3 }
 0x1fb   : > { %v1949_v6 = vpop.f32.mrf.mxu1  ;;  %v1161_v16 = vadd.f32 %v1907_v61, %v1076_v9  ;;  %v996_v46 = vadd.f32 %v1822_v13, %v3360_v7 }
 0x1fd   : > { %v1950_v19 = vpop.f32.mrf.mxu1 }
 0x1fe   : > { %v1951_v23 = vadd.f32 %v1950_v19, %v1949_v6  ;;  %v1866_v19 = vadd.f32 %v3356_v54, %v3352_v24 }
 0x200   : > { %v1246_v0 = vadd.f32 %v1951_v23, %v1161_v16 }
 0x201   : > { %v3365_v17 = vpop.f32.mrf.mxu0 }
 0x203   : > { %v3367_v60 = vpop.f32.mrf.mxu0 }
 0x204   : > { %v1910_v48 = vadd.f32 %v3367_v60, %v3365_v17 }
 0x20a   : > { %v3371_v8 = vpop.f32.mrf.mxu1 }
 0x20c   : > { %v3375_v28 = vpop.f32.mrf.mxu1 }
 0x20f   : > { %v3369_v20 = vpop.f32.mrf.mxu0 }
 0x211   : > { %v3373_v27 = vpop.f32.mrf.mxu0 }
 0x215   : > { %v3377_v31 = vpop.f32.mrf.mxu1 }
 0x217   : > { %v3379_v32 = vpop.f32.mrf.mxu1 }
 0x21e   : > { %v1990_v30 = vpop.f32.mrf.mxu0 }
 0x220   : > { %v1991_v18 = vpop.f32.mrf.mxu0 }
 0x221   : > { %v1992_v56 = vadd.f32 %v1991_v18, %v1990_v30 }
 0x223   : > { %v2034_v35 = vpop.f32.mrf.mxu1  ;;  %v1326_v38 = vadd.f32 %v1992_v56, %v1241_v57 }
 0x225   : > { %v2035_v37 = vpop.f32.mrf.mxu1 }
 0x226   : > { %v2036_v58 = vadd.f32 %v2035_v37, %v2034_v35 }
 0x228   : > { %v1411_v5 = vadd.f32 %v2036_v58, %v1326_v38 }
 0x229   : > { %v1993_v34 = vpop.f32.mrf.mxu0 }
 0x22b   : > { %v1994_v36 = vpop.f32.mrf.mxu0 }
 0x22c   : > { %v1995_v30 = vadd.f32 %v1994_v36, %v1993_v34 }
 0x22e   : > { %v1331_v35 = vadd.f32 %v1995_v30, %v1246_v0 }
 0x232   : > { %v2037_v21 = vpop.f32.mrf.mxu1 }
 0x234   : > { %v2038_v42 = vpop.f32.mrf.mxu1 }
 0x235   : > { %v2039_v18 = vadd.f32 %v2038_v42, %v2037_v21  ;;  %v1081_v21 = vadd.f32 %v1866_v19, %v996_v46  ;;  %v1954_v42 = vadd.f32 %v3375_v28, %v3371_v8  ;;  %v1913_v8 = vadd.f32 %v3373_v27, %v3369_v20 }
 0x237   : > { %v1996_v39 = vpop.f32.mrf.mxu0  ;;  %v1416_v33 = vadd.f32 %v2039_v18, %v1331_v35  ;;  %v1166_v3 = vadd.f32 %v1910_v48, %v1081_v21 }
 0x239   : > { %v1997_v40 = vpop.f32.mrf.mxu0  ;;  %v1251_v14 = vadd.f32 %v1954_v42, %v1166_v3 }
 0x23a   : > { %v1998_v26 = vadd.f32 %v1997_v40, %v1996_v39  ;;  %v1957_v39 = vadd.f32 %v3379_v32, %v3377_v31  ;;  %v1171_v40 = vadd.f32 %v1913_v8, %v3363_v12 }
 0x23c   : > { %v1336_v54 = vadd.f32 %v1998_v26, %v1251_v14  ;;  %v1256_v57 = vadd.f32 %v1957_v39, %v1171_v40 }
 0x23d   : > { %v2040_v45 = vpop.f32.mrf.mxu1 }
 0x23f   : > { %v2041_v50 = vpop.f32.mrf.mxu1 }
 0x240   : > { %v2042_v51 = vadd.f32 %v2041_v50, %v2040_v45 }
 0x242   : > { %v1421_v55 = vadd.f32 %v2042_v51, %v1336_v54 }
 0x246   : > { %v3381_v43 = vpop.f32.mrf.mxu0 }
 0x248   : > { %v3384_v47 = vpop.f32.mrf.mxu0 }
 0x249   : > { %v2001_v45 = vadd.f32 %v3384_v47, %v3381_v43 }
 0x24b   : > { %v3386_v52 = vpop.f32.mrf.mxu1  ;;  %v1341_v63 = vadd.f32 %v2001_v45, %v1256_v57 }
 0x24d   : > { %v2044_v59 = vpop.f32.mrf.mxu1 }
 0x24e   : > { %v2045_v58 = vadd.f32 %v2044_v59, %v3386_v52 }
 0x250   : > { %v1426_v27 = vadd.f32 %v2045_v58, %v1341_v63 }
 0x251   : > { %v2078_v49 = vpop.f32.mrf.mxu0 }
 0x253   : > { %v2079_v2 = vpop.f32.mrf.mxu0 }
 0x254   : > { %v2080_v29 = vadd.f32 %v2079_v2, %v2078_v49 }
 0x256   : > { %v1496_v1 = vadd.f32 %v2080_v29, %v1411_v5 }
 0x25a   : > { %v2122_v4 = vpop.f32.mrf.mxu1 }
 0x25c   : > { %v2123_v10 = vpop.f32.mrf.mxu1 }
 0x25d   : > { %v2124_v11 = vadd.f32 %v2123_v10, %v2122_v4 }
 0x25f   : > { %v1581_v25 = vadd.f32 %v2124_v11, %v1496_v1  ;;  %v2081_v15 = vpop.f32.mrf.mxu0 }
 0x261   : > { %1599 = vst [vmem:[%s3393_s7] sm:$0xff] %v1581_v25  ;;  %v2082_v62 = vpop.f32.mrf.mxu0 }
 0x262   : > { %v2083_v37 = vadd.f32 %v2082_v62, %v2081_v15 }
 0x264   : > { %v1501_v34 = vadd.f32 %v2083_v37, %v1416_v33 }
 0x266   : > { %v2125_v41 = vpop.f32.mrf.mxu1 }
 0x268   : > { %v2126_v6 = vpop.f32.mrf.mxu1 }
 0x269   : > { %v2127_v36 = vadd.f32 %v2126_v6, %v2125_v41 }
 0x26b   : > { %v1586_v44 = vadd.f32 %v2127_v36, %v1501_v34 }
 0x26d   : > { %1600 = vst [vmem:[%s3393_s7 + $0x8] sm:$0xff] %v1586_v44 }
 0x26f   : > { %v2084_v49 = vpop.f32.mrf.mxu0 }
 0x271   : > { %v2085_v24 = vpop.f32.mrf.mxu0 }
 0x272   : > { %v2086_v53 = vadd.f32 %v2085_v24, %v2084_v49 }
 0x274   : > { %v2128_v7 = vpop.f32.mrf.mxu1  ;;  %v1506_v17 = vadd.f32 %v2086_v53, %v1421_v55 }
 0x276   : > { %v2129_v56 = vpop.f32.mrf.mxu1 }
 0x277   : > { %v2130_v60 = vadd.f32 %v2129_v56, %v2128_v7 }
 0x279   : > { %v1591_v2 = vadd.f32 %v2130_v60, %v1506_v17 }
 0x27a   : > { %v2087_v28 = vpop.f32.mrf.mxu0 }
 0x27b   : > { %1601 = vst [vmem:[%s3393_s7 + $0x10] sm:$0xff] %v1591_v2 }
 0x27c   : > { %v2088_v50 = vpop.f32.mrf.mxu0 }
 0x27d   : > { %v2089_v22 = vadd.f32 %v2088_v50, %v2087_v28 }
 0x27f   : > { %v1511_v12 = vadd.f32 %v2089_v22, %v1426_v27 }
 0x283   : > { %v2131_v20 = vpop.f32.mrf.mxu1 }
 0x285   : > { %v2132_v31 = vpop.f32.mrf.mxu1 }
 0x286   : > { %v2133_v32 = vadd.f32 %v2132_v31, %v2131_v20 }
 0x288   : > { %v1596_v43 = vadd.f32 %v2133_v32, %v1511_v12 }
 0x28a   : > { %1602 = vst [vmem:[%s3393_s7 + $0x18] sm:$0xff] %v1596_v43 }
 0x28b   : > { %2452 = shalt.err (!%p2449_p10)
}
 0x28c   : > { %s2453_s9 = scalar_lea.hbm %s3423_s14, 512  ;;  %s2457_s25 = scalar_lea.hbm %s3556_s13, 2048 }
 0x28d   : > { %p2454_p12 = scmp.ne.s32.totalorder %s3423_s14, %s2453_s9  ;;  %p2458_p13 = scmp.lt.s32.totalorder %s3423_s14, %s3556_s13 }
 0x28e   : > { %p2459_p6 = scmp.lt.s32.totalorder %s2457_s25, %s2453_s9 }
 0x28f   : > { %p2455_p11 = pnand %p2454_p12, %p2808_p3 }
 0x290   : > { %p2460_p5 = por %p2459_p6, %p2458_p13 }
 0x291   : > { %p2456_p0 = pneg %p2455_p11 }
 0x293   : > { %p2461_p8 = pnand %p2460_p5, %p2456_p0 }
 0x295   : > { %2464 = shalt.err (!%p2461_p8)
}
 0x296   : > { %s2612_s7 = smov 128   ;;  %s2613_s10 = smov 256  }
 0x297   : > { %s2614_s24 = smov 8  }
 0x298   : > { %2140 = dma.vmem_to_hbm [thread:$0]  (%p2808_p3), %s3418_s27, 512, %s3423_s14, %s3428_s11, %s2612_s7, %s2613_s10, %s2614_s24  }
 0x299 PF: > { %s3557_s15 = sld [smem:[#allocation12_spill]]  ;;  %p2157_p4 = scmp.ge.s32.totalorder %s2587_s28, 2 }
 0x29a   : > { %p3558_p9 = scmp.ne.s32.totalorder %s3544_s29, 0 }
 0x29c   : > { %p2153_p1 = pnand %p2157_p4, %p3558_p9 }
 0x29e   : > { %p2154_p2 = pneg %p2153_p1 }
 0x29f   : > { %s1634_s2 = sand.u32 1, %s3557_s15  }
 0x2a0   : > { %s1635_s4 = scalar_lea.sflag [#allocation4], %s1634_s2 }
 0x2a1   : > { %2530 = dma.done.wait (%p2154_p2), %s1635_s4, 512  }
 0x2a2   : > { %2532 = vsyncadd (%p2154_p2), %s1635_s4, 4294966784  ;;  %s23_s28 = sadd.s32 1, %s2587_s28   ;;  %s3560_s18 = sld [smem:[#allocation22_spill]] }
 0x2a3   : > { %p3456_p7 = scmp.ge.s32.totalorder %s23_s28, 6   ;;  %s3561_s27 = sld [smem:[#allocation21_spill]] }
 0x2a4   : > { %s3562_s23 = sld [smem:[#allocation13_spill]]  ;;  %s3568_s15 = smov %s2539_s16 }
 0x2a5   : > { %s3563_s29 = sld [smem:[#allocation20_spill]]  ;;  %s3569_s16 = smov %s2543_s17 }
 0x2a6   : > { %s3564_s24 = sld [smem:[#allocation16_spill]]  ;;  %s3574_s21 = smov %s2563_s22 }
 0x2a7   : > { %s3565_s25 = sld [smem:[#allocation17_spill]] }
 0x2a8   : > { %s3566_s26 = sld [smem:[#allocation18_spill]]  ;;  %s3570_s17 = smov %s3560_s18 }
 0x2a9   : > { %s3567_s14 = sld [smem:[#allocation19_spill]]  ;;  %s3571_s18 = smov %s2551_s19 }
 0x2aa   : > { %s3572_s19 = smov %s2555_s20  ;;  %s3573_s20 = smov %s3561_s27 }
 0x2ab   : > { %s3575_s22 = smov %s3562_s23  ;;  %s3576_s23 = smov %s3563_s29 }
 0x2ac   :  { %22 = sbr.rel (!%p3456_p7) target bundleno = 17 (0x11), region = 108 }
 0x2af   : > { %s3577_s27 = smov %s3567_s14 }
 0x2b1   :  { %1640 = vsyncpa [#allocation3], 1 }
 0x2b2   :  { %1642 = vsyncpa [#allocation3 + $0x1], 1 }
 0x2b3   :  { %1643 = vsyncpa [#allocation6], 1 }
 0x2b4   :  { %1645 = vsyncpa [#allocation6 + $0x1], 1 }
 0x2b5   :  { %1646 = vsyncpa [#allocation4], 1 }
 0x2b6   :  { %1648 = vsyncpa [#allocation4 + $0x1], 1 }

</bundles_post_ra>
